<compile_context>
chip_gen: v5e
topology: v5e:2x2
jax: 0.10.0
libtpu: 0.0.40
codegen_flags: <defaults>
</compile_context>

<pallas_src>
import jax
import jax.numpy as jnp
from jax.experimental import pallas as pl
from jax.experimental.pallas import tpu as pltpu

EPS = 1e-5
HIGHEST = jax.lax.Precision.HIGHEST
BF16 = jnp.bfloat16
F32 = jnp.float32
TOP = 8   # data rows start at a sublane-tile-aligned offset inside padded buffers


# ---------------------------------------------------------------------------
# Parameter / constant preprocessing (tiny, runs once per call in the wrapper).
# ---------------------------------------------------------------------------
def _resize_matrix(out_size, in_size):
    """M (out, in) such that M @ v == 1D linear interp with align_corners=True."""
    if in_size == 1:
        return jnp.ones((out_size, 1), F32)
    if out_size == 1:
        return jnp.zeros((1, in_size), F32).at[0, 0].set(1.0)
    src = jnp.arange(out_size, dtype=F32) * ((in_size - 1) / (out_size - 1))
    i0 = jnp.clip(jnp.floor(src).astype(jnp.int32), 0, in_size - 1)
    i1 = jnp.clip(i0 + 1, 0, in_size - 1)
    frac = src - i0.astype(F32)
    return ((1.0 - frac)[:, None] * jax.nn.one_hot(i0, in_size, dtype=F32)
            + frac[:, None] * jax.nn.one_hot(i1, in_size, dtype=F32))


def _banded_conv_matrices(w_hwio, W):
    """(3,3,Ci,Co) 'same' 3x3 conv weights -> (3, Ci*W, Co*W) banded matrices.

    A[kh, ci*W + wi, co*W + wo] = w[kh, wi-wo+1, ci, co] if |wi-wo| <= 1 else 0,
    so the width taps (incl. the implicit zero padding) need no sublane shifts;
    only cheap H-offset row slices remain in the kernel.
    """
    Ci, Co = w_hwio.shape[2], w_hwio.shape[3]
    wi = jnp.arange(W)[:, None]
    wo = jnp.arange(W)[None, :]
    T = jnp.stack([(wi == wo + d - 1) for d in range(3)]).astype(F32)  # (3, W, W)
    A = jnp.einsum("kdio,dvw->kivow", w_hwio.astype(F32), T)           # (3,Ci,W,Co,W)
    return A.reshape(3, Ci * W, Co * W)


# ---------------------------------------------------------------------------
# Fused DecoderBlock kernel.
# ---------------------------------------------------------------------------
def _decoder_block_kernel(x2_ref, skip_ref, mh_ref, mw_ref,
                          a1x_ref, a1s_ref, a2_ref, s_ref, st_ref,
                          g1_ref, b1_ref, g2_ref, b2_ref,
                          o_ref, bufx, buf2):
    N = skip_ref.shape[0]
    H = skip_ref.shape[1] - 2            # skip arrives with 1 top + 1 bottom pad row
    CoW = skip_ref.shape[2]
    Hi = mh_ref.shape[1]
    CinW = mw_ref.shape[1]
    Co = s_ref.shape[1]
    W = CoW // Co
    NH = N * H
    cnt = float(NH * W)

    # Zero only the H-pad rows (packed-pair aligned for bf16); interior rows are
    # fully overwritten and rows < TOP-1 are never read.
    bufx[:, TOP - 2:TOP, :] = jnp.zeros((N, 2, CinW), bufx.dtype)
    bufx[:, TOP + H:TOP + H + 2, :] = jnp.zeros((N, 2, CinW), bufx.dtype)
    buf2[:, TOP - 2:TOP, :] = jnp.zeros((N, 2, CoW), buf2.dtype)
    buf2[:, TOP + H:TOP + H + 2, :] = jnp.zeros((N, 2, CoW), buf2.dtype)

    # --- bilinear upsample (align_corners=True): one batched width matmul with the
    #     block-diagonal kron(I_Cin, Mw), then one full-width height matmul per
    #     image, written lane-dense & sublane-aligned into conv-1's input buffer. ---
    t = jnp.dot(x2_ref[...], mw_ref[...], preferred_element_type=F32)  # (N*Hi, Cin*W)
    mh = mh_ref[...]
    for n in range(N):
        up = jnp.dot(mh, t[n * Hi:(n + 1) * Hi, :].astype(BF16),
                     preferred_element_type=F32)                       # (H, Cin*W)
        bufx[n, TOP:TOP + H, :] = up.astype(BF16)

    sel = s_ref[...]        # (Co*W, Co)  channel-sum selector, f32
    selT = st_ref[...]      # (Co, Co*W)  per-channel -> per-lane expander, f32

    def conv_bn_relu(taps, gamma, beta):
        # taps: list of (lhs_slice_fn, banded-weight ref).  Accumulate in vregs,
        # initialized from the first dot (no zeros + add).
        acc = None
        for lhs_of, a_ref in taps:
            for kh in range(3):          # 3 H-offset slices, no W shifts
                d = jnp.dot(lhs_of(kh), a_ref[kh], preferred_element_type=F32)
                acc = d if acc is None else acc + d
        # Two-pass BatchNorm batch stats: XLU row reduction first, then tiny
        # (1, Co*W) @ (Co*W, Co) selector matmuls kept in f32 HIGHEST.
        mean_c = jnp.dot(jnp.sum(acc, axis=0, keepdims=True), sel,
                         precision=HIGHEST) / cnt                      # (1, Co)
        mean_row = jnp.dot(mean_c, selT, precision=HIGHEST)            # (1, Co*W)
        cen = acc - mean_row                                           # row broadcast
        var_c = jnp.dot(jnp.sum(cen * cen, axis=0, keepdims=True), sel,
                        precision=HIGHEST) / cnt                       # (1, Co)
        scale_c = gamma * jax.lax.rsqrt(var_c + EPS)                   # (1, Co)
        scale_row = jnp.dot(scale_c, selT, precision=HIGHEST)          # (1, Co*W)
        beta_row = jnp.dot(beta, selT, precision=HIGHEST)              # (1, Co*W)
        return jnp.maximum(cen * scale_row + beta_row, 0.0)            # fused ReLU

    # conv-1 LHS taps: upsampled-x half + skip half (torch.cat fused away).
    def x_lhs(kh):
        return bufx[:, TOP - 1 + kh:TOP - 1 + kh + H, :].reshape(NH, CinW)

    def skip_lhs(kh):
        return skip_ref[:, kh:kh + H, :].reshape(NH, CoW)

    y1 = conv_bn_relu([(x_lhs, a1x_ref), (skip_lhs, a1s_ref)],
                      g1_ref[...], b1_ref[...])

    buf2[:, TOP:TOP + H, :] = y1.reshape(N, H, CoW).astype(BF16)       # aligned store

    def y1_lhs(kh):
        return buf2[:, TOP - 1 + kh:TOP - 1 + kh + H, :].reshape(NH, CoW)

    y2 = conv_bn_relu([(y1_lhs, a2_ref)], g2_ref[...], b2_ref[...])
    o_ref[...] = y2        # (N*H, Co*W) slab; lane count is a toy-size 64 here


# ---------------------------------------------------------------------------
# Wrapper: DecoderBlock.forward (skip=True, n_dimensions=2).
# ---------------------------------------------------------------------------
def decoder_block_forward(x_nchw, skip_nchw, params):
    """x: (N, Cin, Hi, Wi), skip: (N, Cout, Hs, Ws) -> (N, Cout, Hs, Ws)."""
    N, Cin, Hi, Wi = x_nchw.shape
    _, Cout, Hs, Ws = skip_nchw.shape
    w1, w2 = params["w1"], params["w2"]   # HWIO: (3,3,Cin+Cout,Cout), (3,3,Cout,Cout)

    # Layout plumbing done once in the wrapper (HBM / XLA side):
    #   x -> (N*Hi, Cin*Wi) bf16 ; skip -> (N, Hs+2, Cout*Ws) bf16 with zero H pads.
    x2d = jnp.transpose(x_nchw, (0, 2, 1, 3)).reshape(N * Hi, Cin * Wi).astype(BF16)
    skip3d = jnp.transpose(skip_nchw, (0, 2, 1, 3)).reshape(N, Hs, Cout * Ws)
    skip_pad = jnp.pad(skip3d, ((0, 0), (1, 1), (0, 0))).astype(BF16)

    mh = _resize_matrix(Hs, Hi).astype(BF16)                           # (Hs, Hi)
    mw = jnp.kron(jnp.eye(Cin, dtype=F32),
                  _resize_matrix(Ws, Wi).T).astype(BF16)               # (Cin*Wi, Cin*Ws)
    a1x = _banded_conv_matrices(w1[:, :, :Cin, :], Ws).astype(BF16)
    a1s = _banded_conv_matrices(w1[:, :, Cin:, :], Ws).astype(BF16)
    a2 = _banded_conv_matrices(w2, Ws).astype(BF16)
    lane = jnp.arange(Cout * Ws)
    sel = (lane[:, None] // Ws == jnp.arange(Cout)[None, :]).astype(F32)  # (Co*Ws, Co)
    selT = sel.T                                                          # (Co, Co*Ws)
    g1 = params["g1"].reshape(1, Cout).astype(F32)
    b1 = params["b1"].reshape(1, Cout).astype(F32)
    g2 = params["g2"].reshape(1, Cout).astype(F32)
    b2 = params["b2"].reshape(1, Cout).astype(F32)

    out2d = pl.pallas_call(
        _decoder_block_kernel,
        out_shape=jax.ShapeDtypeStruct((N * Hs, Cout * Ws), F32),
        in_specs=[pl.BlockSpec(memory_space=pltpu.MemorySpace.VMEM)] * 13,
        out_specs=pl.BlockSpec(memory_space=pltpu.MemorySpace.VMEM),
        scratch_shapes=[
            pltpu.VMEM((N, TOP + Hs + 2, Cin * Ws), BF16),    # padded upsampled x
            pltpu.VMEM((N, TOP + Hs + 2, Cout * Ws), BF16),   # padded conv-1 output
        ],
    )(x2d, skip_pad, mh, mw, a1x, a1s, a2, sel, selT, g1, b1, g2, b2)

    # (n*H + h, c*W + w) -> NCHW: free reshape + tiny transpose on the output.
    return out2d.reshape(N, Hs, Cout, Ws).transpose(0, 2, 1, 3)


# ---------------------------------------------------------------------------
# Pure-JAX reference (same bf16-operand / f32-accumulate precision budget).
# ---------------------------------------------------------------------------
def _ref_conv_bn_relu(x_nhwc, w_hwio, gamma, beta):
    xq = x_nhwc.astype(BF16).astype(F32)
    wq = w_hwio.astype(BF16).astype(F32)
    y = jax.lax.conv_general_dilated(
        xq, wq, window_strides=(1, 1), padding="SAME",
        dimension_numbers=("NHWC", "HWIO", "NHWC"), precision=HIGHEST)
    mean = jnp.mean(y, axis=(0, 1, 2), keepdims=True)
    var = jnp.mean((y - mean) ** 2, axis=(0, 1, 2), keepdims=True)
    y = (y - mean) * jax.lax.rsqrt(var + EPS) * gamma + beta
    return jnp.maximum(y, 0.0)


def decoder_block_reference(x_nchw, skip_nchw, params):
    N, Cin, Hi, Wi = x_nchw.shape
    _, Cout, Hs, Ws = skip_nchw.shape
    mh = _resize_matrix(Hs, Hi).astype(BF16).astype(F32)
    mwt = _resize_matrix(Ws, Wi).T.astype(BF16).astype(F32)
    xq = x_nchw.astype(BF16).astype(F32)
    t = jnp.dot(xq.reshape(N * Cin * Hi, Wi), mwt, precision=HIGHEST)
    t = t.reshape(N, Cin, Hi, Ws).astype(BF16).astype(F32)
    up = jnp.einsum("oh,nchw->ncow", mh, t, precision=HIGHEST)     # (N, Cin, Hs, Ws)
    xcat = jnp.concatenate([up, skip_nchw.astype(F32)], axis=1)
    xnhwc = jnp.transpose(xcat, (0, 2, 3, 1))
    y = _ref_conv_bn_relu(xnhwc, params["w1"], params["g1"], params["b1"])
    y = _ref_conv_bn_relu(y, params["w2"], params["g2"], params["b2"])
    return jnp.transpose(y, (0, 3, 1, 2))


if __name__ == "__main__":
    key = jax.random.PRNGKey(0)
    k_x, k_s, k_w1, k_w2 = jax.random.split(key, 4)

    # DecoderBlock(in_channels=4, out_channels=4, skip=True, n_dimensions=2)
    N, Cin, Cout = 2, 4, 4
    Hi = Wi = 8             # low-resolution decoder input
    Hs = Ws = 16            # skip-connection spatial size
    Ccat = Cin + Cout       # conv-1 input channels after the (fused) concat

    x = jax.random.normal(k_x, (N, Cin, Hi, Wi), jnp.float32)
    skip = jax.random.normal(k_s, (N, Cout, Hs, Ws), jnp.float32)

    # Conv weights stored HWIO (= permuted PyTorch OIHW), bias=False.
    # BatchNorm affine defaults: gamma=1, beta=0.
    bound1 = (1.0 / (Ccat * 9)) ** 0.5
    bound2 = (1.0 / (Cout * 9)) ** 0.5
    params = {
        "w1": jax.random.uniform(k_w1, (3, 3, Ccat, Cout), jnp.float32, -bound1, bound1),
        "g1": jnp.ones((Cout,), jnp.float32),
        "b1": jnp.zeros((Cout,), jnp.float32),
        "w2": jax.random.uniform(k_w2, (3, 3, Cout, Cout), jnp.float32, -bound2, bound2),
        "g2": jnp.ones((Cout,), jnp.float32),
        "b2": jnp.zeros((Cout,), jnp.float32),
    }

    fwd = jax.jit(decoder_block_forward)
    out = jax.block_until_ready(fwd(x, skip, params))
    ref = jax.block_until_ready(decoder_block_reference(x, skip, params))

    assert out.shape == (N, Cout, Hs, Ws), out.shape
    max_err = float(jnp.max(jnp.abs(out - ref)))
    assert jnp.allclose(out, ref, atol=1e-2, rtol=1e-2), f"max abs err {max_err}"
    print("KERNEL_OK")
</pallas_src>

<mosaic_0001>
module attributes {stable_mosaic.version = 11 : i64} {
  func.func @_decoder_block_kernel(%arg0: memref<16x32xbf16, #tpu.memory_space<vmem>>, %arg1: memref<2x18x64xbf16, #tpu.memory_space<vmem>>, %arg2: memref<16x8xbf16, #tpu.memory_space<vmem>>, %arg3: memref<32x64xbf16, #tpu.memory_space<vmem>>, %arg4: memref<3x64x64xbf16, #tpu.memory_space<vmem>>, %arg5: memref<3x64x64xbf16, #tpu.memory_space<vmem>>, %arg6: memref<3x64x64xbf16, #tpu.memory_space<vmem>>, %arg7: memref<64x4xf32, #tpu.memory_space<vmem>>, %arg8: memref<4x64xf32, #tpu.memory_space<vmem>>, %arg9: memref<1x4xf32, #tpu.memory_space<vmem>>, %arg10: memref<1x4xf32, #tpu.memory_space<vmem>>, %arg11: memref<1x4xf32, #tpu.memory_space<vmem>>, %arg12: memref<1x4xf32, #tpu.memory_space<vmem>>, %arg13: memref<32x64xf32, #tpu.memory_space<vmem>>, %arg14: memref<2x26x64xbf16, #tpu.memory_space<vmem>>, %arg15: memref<2x26x64xbf16, #tpu.memory_space<vmem>>) attributes {dimension_semantics = [], scalar_prefetch = 0 : i64, scratch_operands = 2 : i64, tpu.core_type = #tpu.core_type<tc>} {
    %cst = arith.constant 0.000000e+00 : bf16
    %0 = vector.broadcast %cst : bf16 to vector<2x2x64xbf16>
    %c0 = arith.constant 0 : index
    %c6 = arith.constant 6 : index
    %c0_0 = arith.constant 0 : index
    %1 = vector.load %arg14[%c0, %c6, %c0_0] : memref<2x26x64xbf16, #tpu.memory_space<vmem>>, vector<2x2x64xbf16>
    tpu.vector_store %arg14[%c0, %c6, %c0_0], %0 {strides = array<i32>} : memref<2x26x64xbf16, #tpu.memory_space<vmem>>, vector<2x2x64xbf16>,
    %cst_1 = arith.constant 0.000000e+00 : bf16
    %2 = vector.broadcast %cst_1 : bf16 to vector<2x2x64xbf16>
    %c0_2 = arith.constant 0 : index
    %c24 = arith.constant 24 : index
    %c0_3 = arith.constant 0 : index
    %3 = vector.load %arg14[%c0_2, %c24, %c0_3] : memref<2x26x64xbf16, #tpu.memory_space<vmem>>, vector<2x2x64xbf16>
    tpu.vector_store %arg14[%c0_2, %c24, %c0_3], %2 {strides = array<i32>} : memref<2x26x64xbf16, #tpu.memory_space<vmem>>, vector<2x2x64xbf16>,
    %cst_4 = arith.constant 0.000000e+00 : bf16
    %4 = vector.broadcast %cst_4 : bf16 to vector<2x2x64xbf16>
    %c0_5 = arith.constant 0 : index
    %c6_6 = arith.constant 6 : index
    %c0_7 = arith.constant 0 : index
    %5 = vector.load %arg15[%c0_5, %c6_6, %c0_7] : memref<2x26x64xbf16, #tpu.memory_space<vmem>>, vector<2x2x64xbf16>
    tpu.vector_store %arg15[%c0_5, %c6_6, %c0_7], %4 {strides = array<i32>} : memref<2x26x64xbf16, #tpu.memory_space<vmem>>, vector<2x2x64xbf16>,
    %cst_8 = arith.constant 0.000000e+00 : bf16
    %6 = vector.broadcast %cst_8 : bf16 to vector<2x2x64xbf16>
    %c0_9 = arith.constant 0 : index
    %c24_10 = arith.constant 24 : index
    %c0_11 = arith.constant 0 : index
    %7 = vector.load %arg15[%c0_9, %c24_10, %c0_11] : memref<2x26x64xbf16, #tpu.memory_space<vmem>>, vector<2x2x64xbf16>
    tpu.vector_store %arg15[%c0_9, %c24_10, %c0_11], %6 {strides = array<i32>} : memref<2x26x64xbf16, #tpu.memory_space<vmem>>, vector<2x2x64xbf16>,
    %c0_12 = arith.constant 0 : index
    %c0_13 = arith.constant 0 : index
    %8 = vector.load %arg0[%c0_12, %c0_13] : memref<16x32xbf16, #tpu.memory_space<vmem>>, vector<16x32xbf16>
    %c0_14 = arith.constant 0 : index
    %c0_15 = arith.constant 0 : index
    %9 = vector.load %arg3[%c0_14, %c0_15] : memref<32x64xbf16, #tpu.memory_space<vmem>>, vector<32x64xbf16>
    %cst_16 = arith.constant dense<0.000000e+00> : vector<16x64xf32>
    %10 = tpu.matmul %8, %9, %cst_16 {dimension_numbers = #tpu.dot_dimension_numbers<[1], [0], [0], [1], [0, 0, 1, 1], [], []>} : vector<16x32xbf16>, vector<32x64xbf16>, vector<16x64xf32> -> vector<16x64xf32>
    %c0_17 = arith.constant 0 : index
    %c0_18 = arith.constant 0 : index
    %11 = vector.load %arg2[%c0_17, %c0_18] : memref<16x8xbf16, #tpu.memory_space<vmem>>, vector<16x8xbf16>
    %12 = vector.extract_strided_slice %10 {offsets = [0, 0], sizes = [8, 64], strides = [1, 1]} : vector<16x64xf32> to vector<8x64xf32>
    %13 = arith.truncf %12 : vector<8x64xf32> to vector<8x64xbf16>
    %cst_19 = arith.constant dense<0.000000e+00> : vector<16x64xf32>
    %14 = tpu.matmul %11, %13, %cst_19 {dimension_numbers = #tpu.dot_dimension_numbers<[1], [0], [0], [1], [0, 0, 1, 1], [], []>} : vector<16x8xbf16>, vector<8x64xbf16>, vector<16x64xf32> -> vector<16x64xf32>
    %15 = arith.truncf %14 : vector<16x64xf32> to vector<16x64xbf16>
    %c0_20 = arith.constant 0 : index
    %c8 = arith.constant 8 : index
    %c0_21 = arith.constant 0 : index
    %16 = vector.load %arg14[%c0_20, %c8, %c0_21] : memref<2x26x64xbf16, #tpu.memory_space<vmem>>, vector<1x16x64xbf16>
    %17 = vector.shape_cast %16 : vector<1x16x64xbf16> to vector<16x64xbf16>
    %18 = vector.shape_cast %15 : vector<16x64xbf16> to vector<1x16x64xbf16>
    tpu.vector_store %arg14[%c0_20, %c8, %c0_21], %18 {strides = array<i32>} : memref<2x26x64xbf16, #tpu.memory_space<vmem>>, vector<1x16x64xbf16>,
    %19 = vector.extract_strided_slice %10 {offsets = [8, 0], sizes = [8, 64], strides = [1, 1]} : vector<16x64xf32> to vector<8x64xf32>
    %20 = arith.truncf %19 : vector<8x64xf32> to vector<8x64xbf16>
    %cst_22 = arith.constant dense<0.000000e+00> : vector<16x64xf32>
    %21 = tpu.matmul %11, %20, %cst_22 {dimension_numbers = #tpu.dot_dimension_numbers<[1], [0], [0], [1], [0, 0, 1, 1], [], []>} : vector<16x8xbf16>, vector<8x64xbf16>, vector<16x64xf32> -> vector<16x64xf32>
    %22 = arith.truncf %21 : vector<16x64xf32> to vector<16x64xbf16>
    %c1 = arith.constant 1 : index
    %c8_23 = arith.constant 8 : index
    %c0_24 = arith.constant 0 : index
    %23 = vector.load %arg14[%c1, %c8_23, %c0_24] : memref<2x26x64xbf16, #tpu.memory_space<vmem>>, vector<1x16x64xbf16>
    %24 = vector.shape_cast %23 : vector<1x16x64xbf16> to vector<16x64xbf16>
    %25 = vector.shape_cast %22 : vector<16x64xbf16> to vector<1x16x64xbf16>
    tpu.vector_store %arg14[%c1, %c8_23, %c0_24], %25 {strides = array<i32>} : memref<2x26x64xbf16, #tpu.memory_space<vmem>>, vector<1x16x64xbf16>,
    %c0_25 = arith.constant 0 : index
    %c0_26 = arith.constant 0 : index
    %26 = vector.load %arg7[%c0_25, %c0_26] : memref<64x4xf32, #tpu.memory_space<vmem>>, vector<64x4xf32>
    %c0_27 = arith.constant 0 : index
    %c0_28 = arith.constant 0 : index
    %27 = vector.load %arg8[%c0_27, %c0_28] : memref<4x64xf32, #tpu.memory_space<vmem>>, vector<4x64xf32>
    %c0_29 = arith.constant 0 : index
    %c0_30 = arith.constant 0 : index
    %28 = vector.load %arg9[%c0_29, %c0_30] : memref<1x4xf32, #tpu.memory_space<vmem>>, vector<1x4xf32>
    %c0_31 = arith.constant 0 : index
    %c0_32 = arith.constant 0 : index
    %29 = vector.load %arg10[%c0_31, %c0_32] : memref<1x4xf32, #tpu.memory_space<vmem>>, vector<1x4xf32>
    %c0_33 = arith.constant 0 : index
    %c7 = arith.constant 7 : index
    %c0_34 = arith.constant 0 : index
    %30 = vector.load %arg14[%c0_33, %c7, %c0_34] : memref<2x26x64xbf16, #tpu.memory_space<vmem>>, vector<2x16x64xbf16>
    %31 = vector.shape_cast %30 : vector<2x16x64xbf16> to vector<32x64xbf16>
    %c0_35 = arith.constant 0 : index
    %c0_36 = arith.constant 0 : index
    %c0_37 = arith.constant 0 : index
    %32 = vector.load %arg4[%c0_35, %c0_36, %c0_37] : memref<3x64x64xbf16, #tpu.memory_space<vmem>>, vector<1x64x64xbf16>
    %33 = vector.shape_cast %32 : vector<1x64x64xbf16> to vector<64x64xbf16>
    %cst_38 = arith.constant dense<0.000000e+00> : vector<32x64xf32>
    %34 = tpu.matmul %31, %33, %cst_38 {dimension_numbers = #tpu.dot_dimension_numbers<[1], [0], [0], [1], [0, 0, 1, 1], [], []>} : vector<32x64xbf16>, vector<64x64xbf16>, vector<32x64xf32> -> vector<32x64xf32>
    %c0_39 = arith.constant 0 : index
    %c8_40 = arith.constant 8 : index
    %c0_41 = arith.constant 0 : index
    %35 = vector.load %arg14[%c0_39, %c8_40, %c0_41] : memref<2x26x64xbf16, #tpu.memory_space<vmem>>, vector<2x16x64xbf16>
    %36 = vector.shape_cast %35 : vector<2x16x64xbf16> to vector<32x64xbf16>
    %c1_42 = arith.constant 1 : index
    %c0_43 = arith.constant 0 : index
    %c0_44 = arith.constant 0 : index
    %37 = vector.load %arg4[%c1_42, %c0_43, %c0_44] : memref<3x64x64xbf16, #tpu.memory_space<vmem>>, vector<1x64x64xbf16>
    %38 = vector.shape_cast %37 : vector<1x64x64xbf16> to vector<64x64xbf16>
    %cst_45 = arith.constant dense<0.000000e+00> : vector<32x64xf32>
    %39 = tpu.matmul %36, %38, %cst_45 {dimension_numbers = #tpu.dot_dimension_numbers<[1], [0], [0], [1], [0, 0, 1, 1], [], []>} : vector<32x64xbf16>, vector<64x64xbf16>, vector<32x64xf32> -> vector<32x64xf32>
    %40 = arith.addf %34, %39 : vector<32x64xf32>
    %c0_46 = arith.constant 0 : index
    %c9 = arith.constant 9 : index
    %c0_47 = arith.constant 0 : index
    %41 = vector.load %arg14[%c0_46, %c9, %c0_47] : memref<2x26x64xbf16, #tpu.memory_space<vmem>>, vector<2x16x64xbf16>
    %42 = vector.shape_cast %41 : vector<2x16x64xbf16> to vector<32x64xbf16>
    %c2 = arith.constant 2 : index
    %c0_48 = arith.constant 0 : index
    %c0_49 = arith.constant 0 : index
    %43 = vector.load %arg4[%c2, %c0_48, %c0_49] : memref<3x64x64xbf16, #tpu.memory_space<vmem>>, vector<1x64x64xbf16>
    %44 = vector.shape_cast %43 : vector<1x64x64xbf16> to vector<64x64xbf16>
    %cst_50 = arith.constant dense<0.000000e+00> : vector<32x64xf32>
    %45 = tpu.matmul %42, %44, %cst_50 {dimension_numbers = #tpu.dot_dimension_numbers<[1], [0], [0], [1], [0, 0, 1, 1], [], []>} : vector<32x64xbf16>, vector<64x64xbf16>, vector<32x64xf32> -> vector<32x64xf32>
    %46 = arith.addf %40, %45 : vector<32x64xf32>
    %c0_51 = arith.constant 0 : index
    %c0_52 = arith.constant 0 : index
    %c0_53 = arith.constant 0 : index
    %47 = vector.load %arg1[%c0_51, %c0_52, %c0_53] : memref<2x18x64xbf16, #tpu.memory_space<vmem>>, vector<2x16x64xbf16>
    %48 = vector.shape_cast %47 : vector<2x16x64xbf16> to vector<32x64xbf16>
    %c0_54 = arith.constant 0 : index
    %c0_55 = arith.constant 0 : index
    %c0_56 = arith.constant 0 : index
    %49 = vector.load %arg5[%c0_54, %c0_55, %c0_56] : memref<3x64x64xbf16, #tpu.memory_space<vmem>>, vector<1x64x64xbf16>
    %50 = vector.shape_cast %49 : vector<1x64x64xbf16> to vector<64x64xbf16>
    %cst_57 = arith.constant dense<0.000000e+00> : vector<32x64xf32>
    %51 = tpu.matmul %48, %50, %cst_57 {dimension_numbers = #tpu.dot_dimension_numbers<[1], [0], [0], [1], [0, 0, 1, 1], [], []>} : vector<32x64xbf16>, vector<64x64xbf16>, vector<32x64xf32> -> vector<32x64xf32>
    %52 = arith.addf %46, %51 : vector<32x64xf32>
    %c0_58 = arith.constant 0 : index
    %c1_59 = arith.constant 1 : index
    %c0_60 = arith.constant 0 : index
    %53 = vector.load %arg1[%c0_58, %c1_59, %c0_60] : memref<2x18x64xbf16, #tpu.memory_space<vmem>>, vector<2x16x64xbf16>
    %54 = vector.shape_cast %53 : vector<2x16x64xbf16> to vector<32x64xbf16>
    %c1_61 = arith.constant 1 : index
    %c0_62 = arith.constant 0 : index
    %c0_63 = arith.constant 0 : index
    %55 = vector.load %arg5[%c1_61, %c0_62, %c0_63] : memref<3x64x64xbf16, #tpu.memory_space<vmem>>, vector<1x64x64xbf16>
    %56 = vector.shape_cast %55 : vector<1x64x64xbf16> to vector<64x64xbf16>
    %cst_64 = arith.constant dense<0.000000e+00> : vector<32x64xf32>
    %57 = tpu.matmul %54, %56, %cst_64 {dimension_numbers = #tpu.dot_dimension_numbers<[1], [0], [0], [1], [0, 0, 1, 1], [], []>} : vector<32x64xbf16>, vector<64x64xbf16>, vector<32x64xf32> -> vector<32x64xf32>
    %58 = arith.addf %52, %57 : vector<32x64xf32>
    %c0_65 = arith.constant 0 : index
    %c2_66 = arith.constant 2 : index
    %c0_67 = arith.constant 0 : index
    %59 = vector.load %arg1[%c0_65, %c2_66, %c0_67] : memref<2x18x64xbf16, #tpu.memory_space<vmem>>, vector<2x16x64xbf16>
    %60 = vector.shape_cast %59 : vector<2x16x64xbf16> to vector<32x64xbf16>
    %c2_68 = arith.constant 2 : index
    %c0_69 = arith.constant 0 : index
    %c0_70 = arith.constant 0 : index
    %61 = vector.load %arg5[%c2_68, %c0_69, %c0_70] : memref<3x64x64xbf16, #tpu.memory_space<vmem>>, vector<1x64x64xbf16>
    %62 = vector.shape_cast %61 : vector<1x64x64xbf16> to vector<64x64xbf16>
    %cst_71 = arith.constant dense<0.000000e+00> : vector<32x64xf32>
    %63 = tpu.matmul %60, %62, %cst_71 {dimension_numbers = #tpu.dot_dimension_numbers<[1], [0], [0], [1], [0, 0, 1, 1], [], []>} : vector<32x64xbf16>, vector<64x64xbf16>, vector<32x64xf32> -> vector<32x64xf32>
    %64 = arith.addf %58, %63 : vector<32x64xf32>
    %cst_72 = arith.constant dense<0.000000e+00> : vector<64xf32>
    %65 = vector.multi_reduction <add>, %64, %cst_72 [0] : vector<32x64xf32> to vector<64xf32>
    %66 = vector.shape_cast %65 : vector<64xf32> to vector<1x64xf32>
    %cst_73 = arith.constant dense<0.000000e+00> : vector<1x4xf32>
    %67 = tpu.matmul %66, %26, %cst_73 {dimension_numbers = #tpu.dot_dimension_numbers<[1], [0], [0], [1], [0, 0, 1, 1], [], []>, precision = #tpu.contract_precision<fp32>} : vector<1x64xf32>, vector<64x4xf32>, vector<1x4xf32> -> vector<1x4xf32>
    %cst_74 = arith.constant 5.120000e+02 : f32
    %68 = vector.broadcast %cst_74 : f32 to vector<1x4xf32>
    %69 = arith.divf %67, %68 : vector<1x4xf32>
    %cst_75 = arith.constant dense<0.000000e+00> : vector<1x64xf32>
    %70 = tpu.matmul %69, %27, %cst_75 {dimension_numbers = #tpu.dot_dimension_numbers<[1], [0], [0], [1], [0, 0, 1, 1], [], []>, precision = #tpu.contract_precision<fp32>} : vector<1x4xf32>, vector<4x64xf32>, vector<1x64xf32> -> vector<1x64xf32>
    %71 = vector.broadcast %70 : vector<1x64xf32> to vector<32x64xf32>
    %72 = arith.subf %64, %71 : vector<32x64xf32>
    %73 = arith.mulf %72, %72 : vector<32x64xf32>
    %cst_76 = arith.constant dense<0.000000e+00> : vector<64xf32>
    %74 = vector.multi_reduction <add>, %73, %cst_76 [0] : vector<32x64xf32> to vector<64xf32>
    %75 = vector.shape_cast %74 : vector<64xf32> to vector<1x64xf32>
    %cst_77 = arith.constant dense<0.000000e+00> : vector<1x4xf32>
    %76 = tpu.matmul %75, %26, %cst_77 {dimension_numbers = #tpu.dot_dimension_numbers<[1], [0], [0], [1], [0, 0, 1, 1], [], []>, precision = #tpu.contract_precision<fp32>} : vector<1x64xf32>, vector<64x4xf32>, vector<1x4xf32> -> vector<1x4xf32>
    %cst_78 = arith.constant 5.120000e+02 : f32
    %77 = vector.broadcast %cst_78 : f32 to vector<1x4xf32>
    %78 = arith.divf %76, %77 : vector<1x4xf32>
    %cst_79 = arith.constant 9.99999974E-6 : f32
    %79 = vector.broadcast %cst_79 : f32 to vector<1x4xf32>
    %80 = arith.addf %78, %79 : vector<1x4xf32>
    %81 = math.rsqrt %80 : vector<1x4xf32>
    %82 = arith.mulf %28, %81 : vector<1x4xf32>
    %cst_80 = arith.constant dense<0.000000e+00> : vector<1x64xf32>
    %83 = tpu.matmul %82, %27, %cst_80 {dimension_numbers = #tpu.dot_dimension_numbers<[1], [0], [0], [1], [0, 0, 1, 1], [], []>, precision = #tpu.contract_precision<fp32>} : vector<1x4xf32>, vector<4x64xf32>, vector<1x64xf32> -> vector<1x64xf32>
    %cst_81 = arith.constant dense<0.000000e+00> : vector<1x64xf32>
    %84 = tpu.matmul %29, %27, %cst_81 {dimension_numbers = #tpu.dot_dimension_numbers<[1], [0], [0], [1], [0, 0, 1, 1], [], []>, precision = #tpu.contract_precision<fp32>} : vector<1x4xf32>, vector<4x64xf32>, vector<1x64xf32> -> vector<1x64xf32>
    %85 = vector.broadcast %83 : vector<1x64xf32> to vector<32x64xf32>
    %86 = arith.mulf %72, %85 : vector<32x64xf32>
    %87 = vector.broadcast %84 : vector<1x64xf32> to vector<32x64xf32>
    %88 = arith.addf %86, %87 : vector<32x64xf32>
    %cst_82 = arith.constant 0.000000e+00 : f32
    %89 = vector.broadcast %cst_82 : f32 to vector<32x64xf32>
    %90 = arith.maximumf %88, %89 : vector<32x64xf32>
    %91 = vector.shape_cast %90 : vector<32x64xf32> to vector<2x16x64xf32>
    %92 = arith.truncf %91 : vector<2x16x64xf32> to vector<2x16x64xbf16>
    %c0_83 = arith.constant 0 : index
    %c8_84 = arith.constant 8 : index
    %c0_85 = arith.constant 0 : index
    %93 = vector.load %arg15[%c0_83, %c8_84, %c0_85] : memref<2x26x64xbf16, #tpu.memory_space<vmem>>, vector<2x16x64xbf16>
    tpu.vector_store %arg15[%c0_83, %c8_84, %c0_85], %92 {strides = array<i32>} : memref<2x26x64xbf16, #tpu.memory_space<vmem>>, vector<2x16x64xbf16>,
    %c0_86 = arith.constant 0 : index
    %c0_87 = arith.constant 0 : index
    %94 = vector.load %arg11[%c0_86, %c0_87] : memref<1x4xf32, #tpu.memory_space<vmem>>, vector<1x4xf32>
    %c0_88 = arith.constant 0 : index
    %c0_89 = arith.constant 0 : index
    %95 = vector.load %arg12[%c0_88, %c0_89] : memref<1x4xf32, #tpu.memory_space<vmem>>, vector<1x4xf32>
    %c0_90 = arith.constant 0 : index
    %c7_91 = arith.constant 7 : index
    %c0_92 = arith.constant 0 : index
    %96 = vector.load %arg15[%c0_90, %c7_91, %c0_92] : memref<2x26x64xbf16, #tpu.memory_space<vmem>>, vector<2x16x64xbf16>
    %97 = vector.shape_cast %96 : vector<2x16x64xbf16> to vector<32x64xbf16>
    %c0_93 = arith.constant 0 : index
    %c0_94 = arith.constant 0 : index
    %c0_95 = arith.constant 0 : index
    %98 = vector.load %arg6[%c0_93, %c0_94, %c0_95] : memref<3x64x64xbf16, #tpu.memory_space<vmem>>, vector<1x64x64xbf16>
    %99 = vector.shape_cast %98 : vector<1x64x64xbf16> to vector<64x64xbf16>
    %cst_96 = arith.constant dense<0.000000e+00> : vector<32x64xf32>
    %100 = tpu.matmul %97, %99, %cst_96 {dimension_numbers = #tpu.dot_dimension_numbers<[1], [0], [0], [1], [0, 0, 1, 1], [], []>} : vector<32x64xbf16>, vector<64x64xbf16>, vector<32x64xf32> -> vector<32x64xf32>
    %c0_97 = arith.constant 0 : index
    %c8_98 = arith.constant 8 : index
    %c0_99 = arith.constant 0 : index
    %101 = vector.load %arg15[%c0_97, %c8_98, %c0_99] : memref<2x26x64xbf16, #tpu.memory_space<vmem>>, vector<2x16x64xbf16>
    %102 = vector.shape_cast %101 : vector<2x16x64xbf16> to vector<32x64xbf16>
    %c1_100 = arith.constant 1 : index
    %c0_101 = arith.constant 0 : index
    %c0_102 = arith.constant 0 : index
    %103 = vector.load %arg6[%c1_100, %c0_101, %c0_102] : memref<3x64x64xbf16, #tpu.memory_space<vmem>>, vector<1x64x64xbf16>
    %104 = vector.shape_cast %103 : vector<1x64x64xbf16> to vector<64x64xbf16>
    %cst_103 = arith.constant dense<0.000000e+00> : vector<32x64xf32>
    %105 = tpu.matmul %102, %104, %cst_103 {dimension_numbers = #tpu.dot_dimension_numbers<[1], [0], [0], [1], [0, 0, 1, 1], [], []>} : vector<32x64xbf16>, vector<64x64xbf16>, vector<32x64xf32> -> vector<32x64xf32>
    %106 = arith.addf %100, %105 : vector<32x64xf32>
    %c0_104 = arith.constant 0 : index
    %c9_105 = arith.constant 9 : index
    %c0_106 = arith.constant 0 : index
    %107 = vector.load %arg15[%c0_104, %c9_105, %c0_106] : memref<2x26x64xbf16, #tpu.memory_space<vmem>>, vector<2x16x64xbf16>
    %108 = vector.shape_cast %107 : vector<2x16x64xbf16> to vector<32x64xbf16>
    %c2_107 = arith.constant 2 : index
    %c0_108 = arith.constant 0 : index
    %c0_109 = arith.constant 0 : index
    %109 = vector.load %arg6[%c2_107, %c0_108, %c0_109] : memref<3x64x64xbf16, #tpu.memory_space<vmem>>, vector<1x64x64xbf16>
    %110 = vector.shape_cast %109 : vector<1x64x64xbf16> to vector<64x64xbf16>
    %cst_110 = arith.constant dense<0.000000e+00> : vector<32x64xf32>
    %111 = tpu.matmul %108, %110, %cst_110 {dimension_numbers = #tpu.dot_dimension_numbers<[1], [0], [0], [1], [0, 0, 1, 1], [], []>} : vector<32x64xbf16>, vector<64x64xbf16>, vector<32x64xf32> -> vector<32x64xf32>
    %112 = arith.addf %106, %111 : vector<32x64xf32>
    %cst_111 = arith.constant dense<0.000000e+00> : vector<64xf32>
    %113 = vector.multi_reduction <add>, %112, %cst_111 [0] : vector<32x64xf32> to vector<64xf32>
    %114 = vector.shape_cast %113 : vector<64xf32> to vector<1x64xf32>
    %cst_112 = arith.constant dense<0.000000e+00> : vector<1x4xf32>
    %115 = tpu.matmul %114, %26, %cst_112 {dimension_numbers = #tpu.dot_dimension_numbers<[1], [0], [0], [1], [0, 0, 1, 1], [], []>, precision = #tpu.contract_precision<fp32>} : vector<1x64xf32>, vector<64x4xf32>, vector<1x4xf32> -> vector<1x4xf32>
    %cst_113 = arith.constant 5.120000e+02 : f32
    %116 = vector.broadcast %cst_113 : f32 to vector<1x4xf32>
    %117 = arith.divf %115, %116 : vector<1x4xf32>
    %cst_114 = arith.constant dense<0.000000e+00> : vector<1x64xf32>
    %118 = tpu.matmul %117, %27, %cst_114 {dimension_numbers = #tpu.dot_dimension_numbers<[1], [0], [0], [1], [0, 0, 1, 1], [], []>, precision = #tpu.contract_precision<fp32>} : vector<1x4xf32>, vector<4x64xf32>, vector<1x64xf32> -> vector<1x64xf32>
    %119 = vector.broadcast %118 : vector<1x64xf32> to vector<32x64xf32>
    %120 = arith.subf %112, %119 : vector<32x64xf32>
    %121 = arith.mulf %120, %120 : vector<32x64xf32>
    %cst_115 = arith.constant dense<0.000000e+00> : vector<64xf32>
    %122 = vector.multi_reduction <add>, %121, %cst_115 [0] : vector<32x64xf32> to vector<64xf32>
    %123 = vector.shape_cast %122 : vector<64xf32> to vector<1x64xf32>
    %cst_116 = arith.constant dense<0.000000e+00> : vector<1x4xf32>
    %124 = tpu.matmul %123, %26, %cst_116 {dimension_numbers = #tpu.dot_dimension_numbers<[1], [0], [0], [1], [0, 0, 1, 1], [], []>, precision = #tpu.contract_precision<fp32>} : vector<1x64xf32>, vector<64x4xf32>, vector<1x4xf32> -> vector<1x4xf32>
    %cst_117 = arith.constant 5.120000e+02 : f32
    %125 = vector.broadcast %cst_117 : f32 to vector<1x4xf32>
    %126 = arith.divf %124, %125 : vector<1x4xf32>
    %cst_118 = arith.constant 9.99999974E-6 : f32
    %127 = vector.broadcast %cst_118 : f32 to vector<1x4xf32>
    %128 = arith.addf %126, %127 : vector<1x4xf32>
    %129 = math.rsqrt %128 : vector<1x4xf32>
    %130 = arith.mulf %94, %129 : vector<1x4xf32>
    %cst_119 = arith.constant dense<0.000000e+00> : vector<1x64xf32>
    %131 = tpu.matmul %130, %27, %cst_119 {dimension_numbers = #tpu.dot_dimension_numbers<[1], [0], [0], [1], [0, 0, 1, 1], [], []>, precision = #tpu.contract_precision<fp32>} : vector<1x4xf32>, vector<4x64xf32>, vector<1x64xf32> -> vector<1x64xf32>
    %cst_120 = arith.constant dense<0.000000e+00> : vector<1x64xf32>
    %132 = tpu.matmul %95, %27, %cst_120 {dimension_numbers = #tpu.dot_dimension_numbers<[1], [0], [0], [1], [0, 0, 1, 1], [], []>, precision = #tpu.contract_precision<fp32>} : vector<1x4xf32>, vector<4x64xf32>, vector<1x64xf32> -> vector<1x64xf32>
    %133 = vector.broadcast %131 : vector<1x64xf32> to vector<32x64xf32>
    %134 = arith.mulf %120, %133 : vector<32x64xf32>
    %135 = vector.broadcast %132 : vector<1x64xf32> to vector<32x64xf32>
    %136 = arith.addf %134, %135 : vector<32x64xf32>
    %cst_121 = arith.constant 0.000000e+00 : f32
    %137 = vector.broadcast %cst_121 : f32 to vector<32x64xf32>
    %138 = arith.maximumf %136, %137 : vector<32x64xf32>
    %c0_122 = arith.constant 0 : index
    %c0_123 = arith.constant 0 : index
    %139 = vector.load %arg13[%c0_122, %c0_123] : memref<32x64xf32, #tpu.memory_space<vmem>>, vector<32x64xf32>
    tpu.vector_store %arg13[%c0_122, %c0_123], %138 {strides = array<i32>} : memref<32x64xf32, #tpu.memory_space<vmem>>, vector<32x64xf32>,
    return
  }
}

</mosaic_0001>

<bundles_post_ra>
// kernel: decoder_block_forward.1
= control target key start
LH: loop header
LB: loop body
LE: loop exit
PB: predicated region body
PF: predicated region fallthrough
CT: control target
= control target key end

     0   :  { %vm78_vm0 = vcmask 261120   ;;  %vm108_vm1 = vcmask 1043456   ;;  %vm104_vm2 = vcmask 64512   ;;  %vm45_vm3 = vcmask 519171   ;;  %s4241_s3 = inlined_call_operand.vmem [shape: bf16[32,64], index: 3, kind: input, shape index: {}]   ;;  %s4242_s0 = inlined_call_operand.vmem [shape: bf16[16,32], index: 0, kind: input, shape index: {}]   ;;  %s4243_s2 = inlined_call_operand.vmem [shape: bf16[16,8], index: 2, kind: input, shape index: {}]   ;;  %s4244_s4 = inlined_call_operand.vmem [shape: bf16[3,64,64], index: 4, kind: input, shape index: {}]   ;;  %s4245_s5 = inlined_call_operand.vmem [shape: bf16[3,64,64], index: 5, kind: input, shape index: {}]   ;;  %s4246_s1 = inlined_call_operand.vmem [shape: bf16[2,18,64], index: 1, kind: input, shape index: {}]   ;;  %s4247_s7 = inlined_call_operand.vmem [shape: f32[64,4], index: 7, kind: input, shape index: {}]   ;;  %s4248_s8 = inlined_call_operand.vmem [shape: f32[4,64], index: 8, kind: input, shape index: {}]   ;;  %s4249_s9 = inlined_call_operand.vmem [shape: f32[1,4], index: 9, kind: input, shape index: {}]   ;;  %s4250_s10 = inlined_call_operand.vmem [shape: f32[1,4], index: 10, kind: input, shape index: {}]   ;;  %s4251_s6 = inlined_call_operand.vmem [shape: bf16[3,64,64], index: 6, kind: input, shape index: {}]   ;;  %s4252_s11 = inlined_call_operand.vmem [shape: f32[1,4], index: 11, kind: input, shape index: {}]   ;;  %s4253_s12 = inlined_call_operand.vmem [shape: f32[1,4], index: 12, kind: input, shape index: {}]   ;;  %s4254_s13 = inlined_call_operand.vmem [shape: f32[32,64], index: 13, kind: output, shape index: {}]  }
   0x1   :  { %v3338_v0 = vld [vmem:[%s4241_s3 + $0x8] sm:$0xff]  ;;  %v3337_v1 = vld [vmem:[%s4241_s3] sm:$0xff]  ;;  %v3349_v10 = vld [vmem:[%s4244_s4 + $0x38] sm:$0xff]  ;;  %v3390_v11 = vmov 0   ;;  %vm48_vm4 = vcmask 516096   ;;  %vm128_vm5 = vcmask 519168  }
   0x2   :  { %88 = vmatpush.bf16.msra.mxu0 %v3338_v0  ;;  %v3336_v2 = vld [vmem:[%s4242_s0] sm:$0xff]  ;;  %280 = vmatpush.bf16.msra.mxu3 %v3349_v10  ;;  %46 = vst.msk [vmem:[#allocation2] sm:$0x8] %vm45_vm3, %v3390_v11  ;;  %v3348_v12 = vld [vmem:[%s4244_s4 + $0x30] sm:$0xff]  ;;  %v3347_v13 = vld [vmem:[%s4244_s4 + $0x28] sm:$0xff]  ;;  %vm269_vm6 = vcmask 523264  }
   0x3   :  { %v3339_v6 = vld [vmem:[%s4243_s2] sm:$0xff]  ;;  %47 = vst.msk [vmem:[#allocation2 + $0x10] sm:$0x8] %vm45_vm3, %v3390_v11  ;;  %v3345_v14 = vld [vmem:[%s4244_s4 + $0x18] sm:$0xff]  ;;  %v3344_v17 = vld [vmem:[%s4244_s4 + $0x10] sm:$0xff]  ;;  %vm680_vm13 = vcmask 1042432  }
   0x4   :  { %51 = vst.msk [vmem:[#allocation3] sm:$0x8] %vm45_vm3, %v3390_v11  ;;  %v3353_v15 = vld [vmem:[%s4244_s4 + $0x58] sm:$0xff]  ;;  %v3346_v16 = vld [vmem:[%s4244_s4 + $0x20] sm:$0xff]  ;;  %v3352_v18 = vld [vmem:[%s4244_s4 + $0x50] sm:$0xff]  ;;  %vm681_vm14 = vcmask 1046532  }
   0x5   :  { %52 = vst.msk [vmem:[#allocation3 + $0x10] sm:$0x8] %vm45_vm3, %v3390_v11  ;;  %v3343_v19 = vld [vmem:[%s4244_s4 + $0x8] sm:$0xff]  ;;  %v3359_v21 = vld [vmem:[%s4245_s5 + $0x18] sm:$0xff]  ;;  %v3342_v23 = vld [vmem:[%s4244_s4] sm:$0xff] }
   0x6   :  { %89 = vmatpush.bf16.msra.mxu0 %v3337_v1  ;;  %281 = vmatpush.bf16.msra.mxu3 %v3348_v12  ;;  %49 = vst.msk [vmem:[#allocation2 + $0xc] sm:$0x1] %vm48_vm4, %v3390_v11  ;;  %v3351_v20 = vld [vmem:[%s4244_s4 + $0x48] sm:$0xff]  ;;  %v3363_v22 = vld [vmem:[%s4245_s5 + $0x38] sm:$0xff]  ;;  %v3350_v24 = vld [vmem:[%s4244_s4 + $0x40] sm:$0xff] }
   0x7   :  { %50 = vst.msk [vmem:[#allocation2 + $0x1c] sm:$0x1] %vm48_vm4, %v3390_v11  ;;  %v3358_v25 = vld [vmem:[%s4245_s5 + $0x10] sm:$0xff]  ;;  %v3367_v27 = vld [vmem:[%s4245_s5 + $0x58] sm:$0xff]  ;;  %v3357_v28 = vld [vmem:[%s4245_s5 + $0x8] sm:$0xff] }
   0x8   :  { %53 = vst.msk [vmem:[#allocation3 + $0xc] sm:$0x1] %vm48_vm4, %v3390_v11  ;;  %v3362_v26 = vld [vmem:[%s4245_s5 + $0x30] sm:$0xff]  ;;  %v3356_v31 = vld [vmem:[%s4245_s5] sm:$0xff]  ;;  %v3361_v32 = vld [vmem:[%s4245_s5 + $0x28] sm:$0xff] }
   0x9   :  { %3089 = vmatmul.msk.bf16.vlgmr.msra.gmra.mxu0 %vm78_vm0, %v3336_v2  ;;  %54 = vst.msk [vmem:[#allocation3 + $0x1c] sm:$0x1] %vm48_vm4, %v3390_v11  ;;  %v3366_v33 = vld [vmem:[%s4245_s5 + $0x50] sm:$0xff]  ;;  %v3354_v34 = vld [vmem:[%s4246_s1] sm:$0xff]  ;;  %v3365_v48 = vld [vmem:[%s4245_s5 + $0x48] sm:$0xff] }
   0xa   :  { %282 = vmatpush.bf16.msra.mxu3 %v3347_v13  ;;  %531 = vmatpush.bf16.msrb.mxu0 %v3359_v21  ;;  %v165_v37 = vld [vmem:[#allocation2] sm:$0x8]  ;;  %vm171_vm7 = vsmask.f32 256  ;;  %vm172_vm8 = vsmask.f32 4368  ;;  %vm3627_vm15 = vmor %vm680_vm13, %vm681_vm14 }
   0xb   :  { %v175_v45 = vshrl.u32 %v165_v37, 16  ;;  %v3360_v47 = vld [vmem:[%s4245_s5 + $0x20] sm:$0xff]  ;;  %vm356_vm9 = vsmask.f32 3328  ;;  %vm357_vm10 = vsmask.f32 7440  ;;  %vm3556_vm11 = vmor %vm171_vm7, %vm172_vm8 }
   0xc   :  { %v550_v54 = vld [vmem:[%s4246_s1] sm:$0xf]  ;;  %v3563_v1 = vld [vmem:[%s4246_s1 + $0x4] sm:$0xf]  ;;  %vm3576_vm12 = vmor %vm356_vm9, %vm357_vm10 }
   0xd   :  { %v352_v43 = vld [vmem:[#allocation2 + $0xc] sm:$0x1]  ;;  %v3096_v57 = vrot.slane %v175_v45, 11 }
   0xe   :  { %283 = vmatpush.bf16.msra.mxu3 %v3346_v16  ;;  %532 = vmatpush.bf16.msrb.mxu0 %v3358_v25  ;;  %v379_v53 = vshll.u32 %v352_v43, 16  ;;  %v570_v16 = vshrl.u32 %v3563_v1, 16 }
  0x10   :  { %v381_v2 = vrot.slane %v379_v53, 5 }
  0x12   :  { %653 = vmatpush.bf16.msrb.mxu3 %v3363_v22  ;;  %533 = vmatpush.bf16.msrb.mxu0 %v3357_v28 }
  0x16   :  { %654 = vmatpush.bf16.msrb.mxu3 %v3362_v26  ;;  %534 = vmatpush.bf16.msrb.mxu0 %v3356_v31 }
  0x19   :  { %3200 = vmatmul.msk.bf16.vlgmr.msrb.gmra.mxu0 %vm269_vm6, %v3354_v34 }
  0x1a   :  { %655 = vmatpush.bf16.msrb.mxu3 %v3361_v32 }
  0x1e   :  { %656 = vmatpush.bf16.msrb.mxu3 %v3360_v47 }
  0x86   :  { %v91_v3 = vpop.f32.mrf.mxu0 }
  0x87   :  { %v98_v4 = vpack.c.bf16 %v91_v3, %v91_v3  ;;  %v557_v3 = vshrl.u32 %v550_v54, 16 }
  0x89   :  { %v110_v5 = vsel %vm108_vm1, %v98_v4, 0  ;;  %v560_v4 = vshll.u32 %v550_v54, 16 }
  0x8a   :  { %119 = vmatpush.bf16.msra.mxu1 %v110_v5  ;;  %v3364_v5 = vld [vmem:[%s4245_s5 + $0x40] sm:$0xff] }
  0x8d   :  { %3094 = vmatmul.msk.bf16.vlgmr.msra.gmra.mxu1 %vm104_vm2, %v3339_v6 }
  0x8e   :  { %v93_v7 = vpop.f32.mrf.mxu0  ;;  %335 = vmatpush.bf16.msrb.mxu1 %v3345_v14 }
  0x8f   :  { %v131_v8 = vpack.c.bf16 %v93_v7, %v93_v7 }
  0x91   :  { %v133_v9 = vsel %vm108_vm1, %v131_v8, 0 }
  0x92   :  { %142 = vmatpush.bf16.msra.mxu2 %v133_v9  ;;  %336 = vmatpush.bf16.msrb.mxu1 %v3344_v17 }
  0x95   :  { %3095 = vmatmul.msk.bf16.vlgmr.msra.gmra.mxu2 %vm104_vm2, %v3339_v6  ;;  %v3355_v6 = vld [vmem:[%s4246_s1 + $0xc] sm:$0xff] }
  0x96   :  { %456 = vmatpush.bf16.msrb.mxu2 %v3353_v15  ;;  %337 = vmatpush.bf16.msrb.mxu1 %v3343_v19  ;;  %v566_v15 = vshll.u32 %v3563_v1, 16 }
  0x97   :  { %3201 = vmatmul.msk.bf16.gmra.mxu0 %vm269_vm6, %v3355_v6 }
  0x9a   :  { %457 = vmatpush.bf16.msrb.mxu2 %v3352_v18  ;;  %338 = vmatpush.bf16.msrb.mxu1 %v3342_v23  ;;  %v559_v23 = vrot.slane %v557_v3, 4 }
  0x9e   :  { %458 = vmatpush.bf16.msrb.mxu2 %v3351_v20  ;;  %746 = vmatpush.bf16.msra.mxu1 %v3367_v27 }
  0xa2   :  { %459 = vmatpush.bf16.msrb.mxu2 %v3350_v24  ;;  %747 = vmatpush.bf16.msra.mxu1 %v3366_v33  ;;  %v562_v24 = vrot.slane %v560_v4, 5 }
  0xa4   :  { %v563_v43 = vor.u32 %v562_v24, %v559_v23 }
  0xa6   :  { %748 = vmatpush.bf16.msra.mxu1 %v3365_v48 }
  0xaa   :  { %749 = vmatpush.bf16.msra.mxu1 %v3364_v5 }
 0x10a   :  { %v121_v29 = vpop.f32.mrf.mxu1 }
 0x10b   :  { %v126_v30 = vpack.c.bf16 %v121_v29, %v121_v29 }
 0x10d   :  { %129 = vst.msk [vmem:[#allocation2 + $0x4] sm:$0xf] %vm128_vm5, %v126_v30  ;;  %v168_v30 = vld [vmem:[#allocation2 + $0x10] sm:$0x8] }
 0x112   :  { %v123_v35 = vpop.f32.mrf.mxu1 }
 0x113   :  { %v127_v36 = vpack.c.bf16 %v123_v35, %v123_v35  ;;  %v568_v35 = vrot.slane %v566_v15, 5 }
 0x114   :  { %v166_v38 = vld [vmem:[#allocation2 + $0x4] sm:$0xf] }
 0x115   :  { %v350_v39 = vld [vmem:[#allocation2 + $0x4] sm:$0xf]  ;;  %130 = vst.msk [vmem:[#allocation2 + $0x8] sm:$0xf] %vm128_vm5, %v127_v36  ;;  %v180_v40 = vshrl.u32 %v166_v38, 16  ;;  %v183_v52 = vshll.u32 %v166_v38, 16 }
 0x116   :  { %v360_v41 = vshrl.u32 %v350_v39, 16  ;;  %v363_v42 = vshll.u32 %v350_v39, 16  ;;  %v572_v39 = vrot.slane %v570_v16, 4 }
 0x117   :  { %v182_v46 = vrot.slane %v180_v40, 7  ;;  %v197_v40 = vshrl.u32 %v168_v30, 16  ;;  %v685_v30 = vrot.slane %v3563_v1, 5 }
 0x118   :  { %v144_v44 = vpop.f32.mrf.mxu2  ;;  %v362_v50 = vrot.slane %v360_v41, 4  ;;  %v365_v51 = vrot.slane %v363_v42, 5  ;;  %v3593_v42 = vld [vmem:[%s4246_s1 + $0x8] sm:$0x1] }
 0x119   :  { %v149_v49 = vpack.c.bf16 %v144_v44, %v144_v44  ;;  %v185_v58 = vor.u32 %v183_v52, %v182_v46  ;;  %v187_v13 = vrot.slane %v182_v46, 4  ;;  %v355_v46 = vld [vmem:[#allocation2 + $0x1c] sm:$0x1]  ;;  %v576_v52 = vshll.u32 %v3593_v42, 16 }
 0x11a   :  { %v366_v62 = vor.u32 %v365_v51, %v362_v50  ;;  %v573_v51 = vor.u32 %v572_v39, %v568_v35  ;;  %v555_v39 = vld [vmem:[%s4246_s1 + $0x14] sm:$0x1]  ;;  %v688_v1 = vrot.slane %v3593_v42, 5 }
 0x11b   :  { %152 = vst.msk [vmem:[#allocation2 + $0x14] sm:$0xf] %vm128_vm5, %v149_v49  ;;  %v186_v12 = vsel %vm3556_vm11, %v3096_v57, %v185_v58  ;;  %v3097_v58 = vrot.slane %v197_v40, 11  ;;  %v578_v5 = vrot.slane %v576_v52, 5 }
 0x11c   :  { %v3340_v55 = vld [vmem:[#allocation2 + $0x4] sm:$0xff]  ;;  %v367_v19 = vrot.slane %v366_v62, 4  ;;  %v295_v26 = vunpack.c.l.b16 %v186_v12  ;;  %v564_v62 = vrot.slane %v563_v43, 4  ;;  %v574_v4 = vrot.slane %v573_v51, 4  ;;  %v554_v12 = vld [vmem:[%s4246_s1 + $0x10] sm:$0xf] }
 0x11d   :  { %v167_v56 = vld [vmem:[#allocation2 + $0x8] sm:$0xf]  ;;  %3130 = vmatmul.msk.bf16.vlgmr.msra.gmra.mxu3 %vm269_vm6, %v3340_v55  ;;  %v590_v24 = vshll.u32 %v554_v12, 16 }
 0x11e   :  { %v351_v59 = vld [vmem:[#allocation2 + $0x8] sm:$0xf]  ;;  %v189_v61 = vshrl.u32 %v167_v56, 16  ;;  %v192_v8 = vshll.u32 %v167_v56, 16  ;;  %v403_v56 = vshll.u32 %v355_v46, 16 }
 0x11f   :  { %v369_v63 = vshll.u32 %v351_v59, 16  ;;  %v373_v0 = vshrl.u32 %v351_v59, 16 }
 0x120   :  { %v191_v7 = vrot.slane %v189_v61, 7  ;;  %v146_v11 = vpop.f32.mrf.mxu2 }
 0x121   :  { %v371_v9 = vrot.slane %v369_v63, 5  ;;  %v375_v10 = vrot.slane %v373_v0, 4  ;;  %v150_v17 = vpack.c.bf16 %v146_v11, %v146_v11  ;;  %v569_v11 = vsel %vm3576_vm12, %v564_v62, %v568_v35 }
 0x122   :  { %v194_v18 = vor.u32 %v192_v8, %v191_v7  ;;  %v169_v21 = vld [vmem:[#allocation2 + $0x14] sm:$0xf] }
 0x123   :  { %v376_v20 = vor.u32 %v375_v10, %v371_v9  ;;  %v353_v22 = vld [vmem:[#allocation2 + $0x14] sm:$0xf]  ;;  %153 = vst.msk [vmem:[#allocation2 + $0x18] sm:$0xf] %vm128_vm5, %v150_v17  ;;  %v372_v27 = vsel %vm3576_vm12, %v367_v19, %v371_v9  ;;  %v202_v31 = vshrl.u32 %v169_v21, 16  ;;  %v205_v41 = vshll.u32 %v169_v21, 16 }
 0x124   :  { %v195_v25 = vsel %vm3556_vm11, %v187_v13, %v194_v18  ;;  %v384_v32 = vshrl.u32 %v353_v22, 16  ;;  %v387_v33 = vshll.u32 %v353_v22, 16  ;;  %v416_v37 = vunpack.c.l.b16 %v372_v27  ;;  %v553_v10 = vld [vmem:[%s4246_s1 + $0xc] sm:$0xf] }
 0x125   :  { %v377_v28 = vrot.slane %v376_v20, 4  ;;  %v296_v29 = vunpack.c.l.b16 %v195_v25  ;;  %v204_v45 = vrot.slane %v202_v31, 7  ;;  %v405_v9 = vrot.slane %v403_v56, 5 }
 0x126   :  { %v386_v47 = vrot.slane %v384_v32, 4  ;;  %v389_v48 = vrot.slane %v387_v33, 5  ;;  %v579_v19 = vsel %vm3576_vm12, %v574_v4, %v578_v5  ;;  %v581_v20 = vshrl.u32 %v553_v10, 16  ;;  %v672_v33 = vld [vmem:[%s4246_s1] sm:$0xe] }
 0x127   :  { %v382_v34 = vsel %vm3576_vm12, %v377_v28, %v381_v2  ;;  %v299_v36 = vpack.c.b16 %v296_v29, %v295_v26  ;;  %v207_v59 = vor.u32 %v205_v41, %v204_v45  ;;  %v209_v6 = vrot.slane %v204_v45, 4 }
 0x128   :  { %v417_v38 = vunpack.c.l.b16 %v382_v34  ;;  %v390_v61 = vor.u32 %v389_v48, %v386_v47  ;;  %v584_v21 = vshll.u32 %v553_v10, 16  ;;  %v594_v25 = vshrl.u32 %v554_v12, 16 }
 0x129   :  { %3148 = vmatmul.msk.bf16.vlgmr.msrb.gmra.mxu1 %vm269_vm6, %v299_v36  ;;  %v208_v13 = vsel %vm3556_vm11, %v3097_v58, %v207_v59  ;;  %v613_v28 = vunpack.c.l.b16 %v569_v11  ;;  %v614_v29 = vunpack.c.l.b16 %v579_v19  ;;  %v583_v34 = vrot.slane %v581_v20, 4 }
 0x12a   :  { %v420_v44 = vpack.c.b16 %v417_v38, %v416_v37  ;;  %v170_v49 = vld [vmem:[#allocation2 + $0x18] sm:$0xf]  ;;  %v391_v16 = vrot.slane %v390_v61, 4  ;;  %v297_v26 = vunpack.c.l.b16 %v208_v13  ;;  %v586_v35 = vrot.slane %v584_v21, 5  ;;  %v673_v61 = vld [vmem:[%s4246_s1 + $0xc] sm:$0xe] }
 0x12b   :  { %v354_v50 = vld [vmem:[#allocation2 + $0x18] sm:$0xf]  ;;  %v211_v53 = vshrl.u32 %v170_v49, 16  ;;  %v214_v0 = vshll.u32 %v170_v49, 16  ;;  %v592_v36 = vrot.slane %v590_v24, 5  ;;  %v596_v37 = vrot.slane %v594_v25, 4 }
 0x12c   :  { %3174 = vmatmul.msk.bf16.vlgmr.msrb.gmra.mxu2 %vm269_vm6, %v420_v44  ;;  %v393_v54 = vshll.u32 %v354_v50, 16  ;;  %v397_v55 = vshrl.u32 %v354_v50, 16  ;;  %v3341_v57 = vld [vmem:[#allocation2 + $0x14] sm:$0xff]  ;;  %v3228_v40 = vrot.slane %v672_v33, 9  ;;  %v687_v41 = vrot.slane %v685_v30, 4  ;;  %v159_v21 = vld [vmem:[%s4247_s7 + $0x28] sm:$0xff] }
 0x12d   :  { %v213_v63 = vrot.slane %v211_v53, 7  ;;  %3131 = vmatmul.msk.bf16.gmra.mxu3 %vm269_vm6, %v3341_v57  ;;  %v617_v43 = vpack.c.b16 %v614_v29, %v613_v28  ;;  %v587_v45 = vor.u32 %v586_v35, %v583_v34  ;;  %v597_v46 = vor.u32 %v596_v37, %v592_v36  ;;  %v161_v13 = vld [vmem:[%s4247_s7 + $0x38] sm:$0xff]  ;;  %v158_v25 = vld [vmem:[%s4247_s7 + $0x20] sm:$0xff] }
 0x12e   :  { %v395_v2 = vrot.slane %v393_v54, 5  ;;  %v399_v3 = vrot.slane %v397_v55, 4  ;;  %v600_v47 = vshll.u32 %v555_v39, 16  ;;  %v686_v48 = vsel %vm3627_vm15, %v3228_v40, %v685_v30  ;;  %v3706_v30 = vpop.f32.mrf.mxu0  ;;  %v157_v33 = vld [vmem:[%s4247_s7 + $0x18] sm:$0xff] }
 0x12f   :  { %v216_v7 = vor.u32 %v214_v0, %v213_v63  ;;  %v689_v49 = vsel %vm3627_vm15, %v687_v41, %v688_v1  ;;  %v588_v42 = vrot.slane %v587_v45, 4  ;;  %v598_v50 = vrot.slane %v597_v46, 4  ;;  %v156_v1 = vld [vmem:[%s4247_s7 + $0x10] sm:$0xff] }
 0x130   :  { %v400_v8 = vor.u32 %v399_v3, %v395_v2  ;;  %v396_v22 = vsel %vm3576_vm12, %v391_v16, %v395_v2  ;;  %v602_v51 = vrot.slane %v600_v47, 5  ;;  %v706_v52 = vunpack.c.l.b16 %v686_v48  ;;  %v160_v16 = vld [vmem:[%s4247_s7 + $0x30] sm:$0xff]  ;;  %v155_v47 = vld [vmem:[%s4247_s7 + $0x8] sm:$0xff] }
 0x131   :  { %v217_v15 = vsel %vm3556_vm11, %v209_v6, %v216_v7  ;;  %v418_v32 = vunpack.c.l.b16 %v396_v22  ;;  %v707_v53 = vunpack.c.l.b16 %v689_v49  ;;  %v593_v54 = vsel %vm3576_vm12, %v588_v42, %v592_v36 }
 0x132   :  { %v401_v17 = vrot.slane %v400_v8, 4  ;;  %v298_v18 = vunpack.c.l.b16 %v217_v15  ;;  %v603_v55 = vsel %vm3576_vm12, %v598_v50, %v602_v51  ;;  %v692_v57 = vrot.slane %v554_v12, 5 }
 0x133   :  { %v710_v56 = vpack.c.b16 %v707_v53, %v706_v52  ;;  %v615_v58 = vunpack.c.l.b16 %v593_v54  ;;  %v616_v59 = vunpack.c.l.b16 %v603_v55  ;;  %v3229_v62 = vrot.slane %v673_v61, 9  ;;  %v154_v54 = vld [vmem:[%s4247_s7] sm:$0xff] }
 0x134   :  { %v406_v23 = vsel %vm3576_vm12, %v401_v17, %v405_v9  ;;  %v300_v31 = vpack.c.b16 %v298_v18, %v297_v26  ;;  %v694_v63 = vrot.slane %v692_v57, 4  ;;  %v695_v0 = vrot.slane %v555_v39, 5  ;;  %v162_v26 = vld [vmem:[%s4248_s8] sm:$0xf] }
 0x135   :  { %v419_v27 = vunpack.c.l.b16 %v406_v23  ;;  %v618_v2 = vpack.c.b16 %v616_v59, %v615_v58  ;;  %v693_v3 = vsel %vm3627_vm15, %v3229_v62, %v692_v57  ;;  %v3663_v15 = vand.u32 4294901760, %v161_v13 }
 0x136   :  { %v696_v4 = vsel %vm3627_vm15, %v694_v63, %v695_v0  ;;  %v708_v5 = vunpack.c.l.b16 %v693_v3  ;;  %v3672_v18 = vand.u32 4294901760, %v160_v16  ;;  %v3690_v24 = vand.u32 4294901760, %v159_v21 }
 0x137   :  { %v421_v38 = vpack.c.b16 %v419_v27, %v418_v32  ;;  %v709_v6 = vunpack.c.l.b16 %v696_v4  ;;  %790 = vmatpush.msra.mxu2 %v3663_v15  ;;  %v3670_v17 = vsub.f32 %v161_v13, %v3663_v15  ;;  %998 = vmatpush.msrb.mxu1 %v3663_v15  ;;  %v3703_v29 = vand.u32 4294901760, %v158_v25 }
 0x138   :  { %v3687_v23 = vsub.f32 %v160_v16, %v3672_v18  ;;  %v3711_v32 = vsub.f32 %v159_v21, %v3690_v24  ;;  %v3725_v37 = vand.u32 4294901760, %v157_v33  ;;  %v3746_v44 = vand.u32 4294901760, %v156_v1 }
 0x139   :  { %3149 = vmatmul.msk.bf16.gmra.mxu1 %vm269_vm6, %v300_v31  ;;  %v711_v7 = vpack.c.b16 %v709_v6, %v708_v5  ;;  %v3683_v22 = vand.u32 4294901760, %v3670_v17  ;;  %792 = vmatpush.msra.mxu2 %v3672_v18  ;;  %v3723_v36 = vsub.f32 %v158_v25, %v3703_v29  ;;  %v3771_v53 = vand.u32 4294901760, %v155_v47 }
 0x13a   :  { %1000 = vmatpush.msrb.mxu1 %v3672_v18  ;;  %v3701_v28 = vand.u32 4294901760, %v3687_v23  ;;  %v3730_v39 = vand.u32 4294901760, %v3711_v32  ;;  %v3769_v52 = vsub.f32 %v156_v1, %v3746_v44  ;;  %v3782_v57 = vand.u32 4294901760, %v154_v54 }
 0x13b   :  { %v825_v27 = vsub.f32 %v3670_v17, %v3683_v22  ;;  %955 = vmatpush.msra.mxu3 %v3683_v22  ;;  %794 = vmatpush.msra.mxu2 %v3690_v24  ;;  %v3741_v41 = vand.u32 4294901760, %v3723_v36  ;;  %v3792_v61 = vsub.f32 %v155_v47, %v3771_v53 }
 0x13c   :  { %3175 = vmatmul.msk.bf16.gmra.mxu2 %vm269_vm6, %v421_v38  ;;  %1002 = vmatpush.msrb.mxu1 %v3690_v24  ;;  %v831_v35 = vsub.f32 %v3687_v23, %v3701_v28  ;;  %v1031_v38 = vsel %vm108_vm1, %v162_v26, 0  ;;  %v837_v46 = vsub.f32 %v3711_v32, %v3730_v39  ;;  %v3789_v59 = vand.u32 4294901760, %v3769_v52 }
 0x13d   :  { %3226 = vmatmul.msk.bf16.vlgmr.msrb.gmra.mxu3 %vm269_vm6, %v617_v43  ;;  %v3718_v34 = vand.u32 4294901760, %v825_v27  ;;  %796 = vmatpush.msra.mxu2 %v3703_v29  ;;  %v3744_v43 = vsub.f32 %v157_v33, %v3725_v37  ;;  %v3757_v48 = vand.u32 4294901760, %v1031_v38  ;;  %v843_v49 = vsub.f32 %v3723_v36, %v3741_v41  ;;  %4265 = vst [vmem:[#allocation4_spill] sm:$0xff] %v3792_v61 }
 0x13e   :  { %959 = vmatpush.msra.mxu3 %v3701_v28  ;;  %1004 = vmatpush.msrb.mxu1 %v3703_v29  ;;  %v3738_v40 = vand.u32 4294901760, %v831_v35  ;;  %v3766_v51 = vand.u32 4294901760, %v837_v46  ;;  %v3801_v0 = vsub.f32 %v154_v54, %v3782_v57  ;;  %v855_v3 = vsub.f32 %v3769_v52, %v3789_v59 }
 0x13f   :  { %827 = vmatpush.msra.mxu0 %v3718_v34  ;;  %798 = vmatpush.msra.mxu2 %v3725_v37  ;;  %v3763_v42 = vand.u32 4294901760, %v3744_v43  ;;  %v3778_v55 = vand.u32 4294901760, %v843_v49  ;;  %v3796_v62 = vsub.f32 %v1031_v38, %v3757_v48  ;;  %v3809_v4 = vand.u32 4294901760, %v3792_v61 }
 0x140   :  { %963 = vmatpush.msra.mxu3 %v3730_v39  ;;  %1006 = vmatpush.msrb.mxu1 %v3725_v37  ;;  %4266 = vst [vmem:[#allocation5_spill] sm:$0xff] %v3801_v0  ;;  %v3813_v5 = vand.u32 4294901760, %v3801_v0  ;;  %vm1026_vm1 = vcmask 31744  }
 0x141   :  { %833 = vmatpush.msra.mxu0 %v3738_v40  ;;  %800 = vmatpush.msra.mxu2 %v3746_v44  ;;  %4267 = vst [vmem:[#allocation6_spill] sm:$0xff] %v3809_v4  ;;  %v861_v13 = vsub.f32 %v3792_v61, %v3809_v4  ;;  %v3824_v16 = vand.u32 4294901760, %v3796_v62 }
 0x142   :  { %967 = vmatpush.msra.mxu3 %v3741_v41  ;;  %1008 = vmatpush.msrb.mxu1 %v3746_v44  ;;  %4268 = vst [vmem:[#allocation7_spill] sm:$0xff] %v3813_v5  ;;  %v867_v21 = vsub.f32 %v3801_v0, %v3813_v5 }
 0x143   :  { %839 = vmatpush.msra.mxu0 %v3766_v51  ;;  %802 = vmatpush.msra.mxu2 %v3771_v53  ;;  %v3831_v25 = vand.u32 4294901760, %v861_v13 }
 0x144   :  { %971 = vmatpush.msra.mxu3 %v3763_v42  ;;  %1010 = vmatpush.msrb.mxu1 %v3771_v53  ;;  %v3834_v26 = vand.u32 4294901760, %v867_v21 }
 0x145   :  { %845 = vmatpush.msra.mxu0 %v3778_v55  ;;  %804 = vmatpush.msra.mxu2 %v3782_v57 }
 0x146   :  { %975 = vmatpush.msra.mxu3 %v3789_v59  ;;  %1012 = vmatpush.msrb.mxu1 %v3782_v57 }
 0x147   :  { %885 = vmatpush.msrb.mxu2 %v3670_v17 }
 0x148   :  { %979 = vmatpush.msra.mxu3 %v3809_v4 }
 0x149   :  { %3254 = vmatmul.msk.bf16.vlgmr.msra.gmra.mxu1 %vm269_vm6, %v710_v56  ;;  %v849_v56 = vsub.f32 %v3744_v43, %v3763_v42  ;;  %888 = vmatpush.msrb.mxu2 %v3687_v23 }
 0x14a   :  { %1173 = vmatpush.msra.mxu1 %v3757_v48  ;;  %983 = vmatpush.msra.mxu3 %v3813_v5 }
 0x14b   :  { %v3798_v63 = vand.u32 4294901760, %v849_v56  ;;  %891 = vmatpush.msrb.mxu2 %v3711_v32 }
 0x14c   :  { %1151 = vmatpush.msrb.mxu3 %v3824_v16 }
 0x14d   :  { %3227 = vmatmul.msk.bf16.gmra.mxu3 %vm269_vm6, %v618_v2  ;;  %v538_v2 = vpop.f32.mrf.mxu0  ;;  %851 = vmatpush.msra.mxu0 %v3798_v63 }
 0x14e   :  { %894 = vmatpush.msrb.mxu2 %v3723_v36 }
 0x150   :  { %897 = vmatpush.msrb.mxu2 %v3744_v43 }
 0x152   :  { %900 = vmatpush.msrb.mxu2 %v3769_v52 }
 0x154   :  { %903 = vmatpush.msrb.mxu2 %v3792_v61 }
 0x155   :  { %v541_v1 = vpop.f32.mrf.mxu0 }
 0x156   :  { %906 = vmatpush.msrb.mxu2 %v3801_v0 }
 0x159   :  { %3255 = vmatmul.msk.bf16.gmra.mxu1 %vm269_vm6, %v711_v7  ;;  %v3818_v7 = vand.u32 4294901760, %v855_v3 }
 0x15b   :  { %857 = vmatpush.msra.mxu0 %v3818_v7 }
 0x15d   :  { %863 = vmatpush.msra.mxu0 %v3831_v25 }
 0x15f   :  { %869 = vmatpush.msra.mxu0 %v3834_v26 }
 0x161   :  { %922 = vmatpush.msrb.mxu0 %v3663_v15 }
 0x163   :  { %924 = vmatpush.msrb.mxu0 %v3672_v18 }
 0x165   :  { %926 = vmatpush.msrb.mxu0 %v3690_v24 }
 0x167   :  { %928 = vmatpush.msrb.mxu0 %v3703_v29 }
 0x169   :  { %930 = vmatpush.msrb.mxu0 %v3725_v37 }
 0x16b   :  { %932 = vmatpush.msrb.mxu0 %v3746_v44 }
 0x16d   :  { %934 = vmatpush.msrb.mxu0 %v3771_v53 }
 0x16f   :  { %936 = vmatpush.msrb.mxu0 %v3782_v57 }
 0x1a0   :  { %v3650_v8 = vpop.f32.mrf.mxu3 }
 0x1a6   :  { %v3652_v9 = vpop.f32.mrf.mxu1 }
 0x1a7   :  { %v341_v38 = vadd.f32 %v3652_v9, %v3650_v8 }
 0x1a8   :  { %v3654_v10 = vpop.f32.mrf.mxu3 }
 0x1ae   :  { %v3656_v11 = vpop.f32.mrf.mxu1 }
 0x1af   :  { %v3675_v19 = vpop.f32.mrf.mxu2  ;;  %v343_v35 = vadd.f32 %v3656_v11, %v3654_v10 }
 0x1b0   :  { %v3658_v12 = vpop.f32.mrf.mxu3  ;;  %v471_v54 = vadd.f32 %v3675_v19, %v341_v38 }
 0x1b2   :  { %v546_v8 = vadd.f32 %v3706_v30, %v471_v54  ;;  %v543_v30 = vpop.f32.mrf.mxu0 }
 0x1b6   :  { %v3677_v20 = vpop.f32.mrf.mxu1 }
 0x1b7   :  { %v463_v50 = vpop.f32.mrf.mxu2  ;;  %v346_v47 = vadd.f32 %v3677_v20, %v3658_v12 }
 0x1b8   :  { %v3708_v31 = vpop.f32.mrf.mxu3  ;;  %v472_v49 = vadd.f32 %v463_v50, %v343_v35 }
 0x1ba   :  { %v547_v56 = vadd.f32 %v538_v2, %v472_v49 }
 0x1be   :  { %v3748_v45 = vpop.f32.mrf.mxu1 }
 0x1bf   :  { %v466_v27 = vpop.f32.mrf.mxu2  ;;  %v348_v12 = vadd.f32 %v3748_v45, %v3708_v31 }
 0x1c0   :  { %v3785_v58 = vpop.f32.mrf.mxu3  ;;  %v473_v10 = vadd.f32 %v466_v27, %v346_v47 }
 0x1c1   :  { %v668_v3 = vadd.f32 %v3785_v58, %v546_v8 }
 0x1c2   :  { %v548_v20 = vadd.f32 %v541_v1, %v473_v10 }
 0x1c6   :  { %v751_v6 = vpop.f32.mrf.mxu1 }
 0x1c7   :  { %v468_v9 = vpop.f32.mrf.mxu2  ;;  %v3865_v27 = vadd.f32 %v751_v6, %v668_v3 }
 0x1c8   :  { %v660_v33 = vpop.f32.mrf.mxu3  ;;  %v474_v2 = vadd.f32 %v468_v9, %v348_v12 }
 0x1c9   :  { %v669_v50 = vadd.f32 %v660_v33, %v547_v56  ;;  %v765_v58 = vsel %vm269_vm6, %v3865_v27, 0.0 }
 0x1ca   :  { %v549_v45 = vadd.f32 %v543_v30, %v474_v2 }
 0x1ce   :  { %v753_v46 = vpop.f32.mrf.mxu1 }
 0x1cf   :  { %v3862_v13 = vadd.f32 %v753_v46, %v669_v50 }
 0x1d0   :  { %v663_v11 = vpop.f32.mrf.mxu3 }
 0x1d1   :  { %v670_v21 = vadd.f32 %v663_v11, %v548_v20  ;;  %v766_v33 = vsel %vm269_vm6, %v3862_v13, 0.0 }
 0x1d2   :  { %v767_v6 = vadd.f32 %v766_v33, %v765_v58  ;;  %v3391_v33 = vmov 512.0  }
 0x1d3   :  { %3384 = vrcp.f32 %v3391_v33 }
 0x1d6   :  { %v756_v19 = vpop.f32.mrf.mxu1 }
 0x1d7   :  { %v3867_v35 = vadd.f32 %v756_v19, %v670_v21 }
 0x1d8   :  { %v665_v31 = vpop.f32.mrf.mxu3 }
 0x1d9   :  { %v768_v38 = vsel %vm269_vm6, %v3867_v35, 0.0  ;;  %v671_v1 = vadd.f32 %v665_v31, %v549_v45  ;;  %v1077_v31 = vsub.f32 %v3796_v62, %v3824_v16  ;;  %v3385_v58 = vpop.eup %3384 }
 0x1da   :  { %v769_v49 = vadd.f32 %v768_v38, %v767_v6  ;;  %v1019_v38 = vmul.f32 512.0, %v3385_v58  ;;  %vm1023_vm0 = vweird.f32 %v3385_v58 }
 0x1db   :  { %v3902_v45 = vand.u32 4294901760, %v1077_v31 }
 0x1de   :  { %v758_v46 = vpop.f32.mrf.mxu1 }
 0x1df   :  { %v3877_v47 = vadd.f32 %v758_v46, %v671_v1  ;;  %v1020_v46 = vsub.f32 1.0, %v1019_v38 }
 0x1e1   :  { %v770_v54 = vsel %vm269_vm6, %v3877_v47, 0.0 }
 0x1e2   :  { %v771_v10 = vadd.f32 %v770_v54, %v769_v49  ;;  %v1021_v49 = vmul.f32 %v3385_v58, %v1020_v46 }
 0x1e4   :  { %v772_v11 = vrot.slane %v771_v10, 4 }
 0x1e6   :  { %v773_v56 = vadd.f32 %v772_v11, %v771_v10 }
 0x1e8   :  { %v774_v8 = vrot.slane %v773_v56, 2 }
 0x1ea   :  { %v775_v9 = vadd.f32 %v774_v8, %v773_v56  ;;  %v1022_v8 = vadd.f32 %v3385_v58, %v1021_v49 }
 0x1ec   :  { %v776_v12 = vrot.slane %v775_v9, 1 }
 0x1ee   :  { %v777_v20 = vadd.f32 %v776_v12, %v775_v9 }
 0x1f0   :  { %v779_v50 = vsel %vm269_vm6, %v777_v20, 0 }
 0x1f1   :  { %v805_v19 = vand.u32 4294901760, %v779_v50 }
 0x1f3   :  { %v806_v3 = vsub.f32 %v779_v50, %v805_v19  ;;  %871 = vmatmul.f32.vlgmr.msra.gmra.mxu0 %v805_v19  ;;  %985 = vmatmul.f32.vlgmr.msra.gmra.mxu3 %v805_v19 }
 0x1f4   :  { %1014 = vmatmul.f32.vlgmr.msrb.gmra.mxu1 %v805_v19  ;;  %1308 = vmatpush.msra.mxu3 %v3670_v17  ;;  %v3906_v19 = vsel %vm1023_vm0, %v3385_v58, %v1022_v8 }
 0x1f5   :  { %v807_v2 = vand.u32 4294901760, %v806_v3  ;;  %1345 = vmatpush.msrb.mxu1 %v3663_v15  ;;  %1079 = vmatpush.msra.mxu0 %v3902_v45 }
 0x1f6   :  { %1311 = vmatpush.msra.mxu3 %v3687_v23 }
 0x1f7   :  { %v808_v21 = vsub.f32 %v806_v3, %v807_v2  ;;  %1347 = vmatpush.msrb.mxu1 %v3672_v18 }
 0x1f8   :  { %1314 = vmatpush.msra.mxu3 %v3711_v32 }
 0x1f9   :  { %v809_v30 = vand.u32 4294901760, %v808_v21  ;;  %1349 = vmatpush.msrb.mxu1 %v3690_v24 }
 0x1fa   :  { %1317 = vmatpush.msra.mxu3 %v3723_v36 }
 0x1fb   :  { %810 = vmatmul.f32.vlgmr.msra.gmra.mxu2 %v809_v30  ;;  %940 = vmatmul.f32.vlgmr.msrb.gmra.mxu0 %v807_v2 }
 0x1fc   :  { %1049 = vmatpush.msra.mxu2 %v3757_v48  ;;  %1320 = vmatpush.msra.mxu3 %v3744_v43 }
 0x1fd   :  { %1351 = vmatpush.msrb.mxu1 %v3703_v29  ;;  %1125 = vmatpush.msrb.mxu0 %v3757_v48 }
 0x1fe   :  { %1323 = vmatpush.msra.mxu3 %v3769_v52 }
 0x1ff   :  { %1353 = vmatpush.msrb.mxu1 %v3725_v37 }
 0x200   :  { %1326 = vmatpush.msra.mxu3 %v3792_v61 }
 0x201   :  { %1355 = vmatpush.msrb.mxu1 %v3746_v44 }
 0x202   :  { %1329 = vmatpush.msra.mxu3 %v3801_v0 }
 0x203   :  { %909 = vmatmul.f32.vlgmr.msrb.gmra.mxu2 %v806_v3  ;;  %1357 = vmatpush.msrb.mxu1 %v3771_v53 }
 0x204   :  { %1102 = vmatpush.msrb.mxu2 %v3796_v62 }
 0x205   :  { %1359 = vmatpush.msrb.mxu1 %v3782_v57 }
 0x270   :  { %v872_v1 = vpop.f32.mrf.mxu0 }
 0x271   :  { %v1015_v50 = vpop.f32.mrf.mxu1 }
 0x276   :  { %v986_v12 = vpop.f32.mrf.mxu3 }
 0x278   :  { %v941_v56 = vpop.f32.mrf.mxu0 }
 0x27e   :  { %v811_v6 = vpop.f32.mrf.mxu2 }
 0x27f   :  { %v873_v54 = vadd.f32 %v872_v1, %v811_v6 }
 0x286   :  { %v910_v10 = vpop.f32.mrf.mxu2 }
 0x287   :  { %v911_v11 = vadd.f32 %v910_v10, %v873_v54 }
 0x289   :  { %v942_v9 = vadd.f32 %v941_v56, %v911_v11 }
 0x28b   :  { %v987_v20 = vadd.f32 %v986_v12, %v942_v9 }
 0x28d   :  { %v1016_v3 = vadd.f32 %v1015_v50, %v987_v20 }
 0x28f   :  { %v1025_v2 = vmul.f32 %v3906_v19, %v1016_v3 }
 0x291   :  { %v1028_v21 = vsel %vm1026_vm1, %v1025_v2, 0 }
 0x292   :  { %v1050_v30 = vand.u32 4294901760, %v1028_v21 }
 0x294   :  { %v1051_v31 = vsub.f32 %v1028_v21, %v1050_v30  ;;  %1081 = vmatmul.f32.vlgmr.msra.gmra.mxu0 %v1050_v30  ;;  %1153 = vmatmul.f32.vlgmr.msrb.gmra.mxu3 %v1050_v30 }
 0x295   :  { %1175 = vmatmul.f32.vlgmr.msra.gmra.mxu1 %v1050_v30  ;;  %1250 = vmatpush.msra.mxu0 %v3718_v34 }
 0x296   :  { %v1052_v33 = vand.u32 4294901760, %v1051_v31  ;;  %1503 = vmatpush.msra.mxu1 %v3902_v45  ;;  %1473 = vmatpush.msrb.mxu3 %v3757_v48 }
 0x297   :  { %1256 = vmatpush.msra.mxu0 %v3738_v40 }
 0x298   :  { %v1053_v58 = vsub.f32 %v1051_v31, %v1052_v33 }
 0x299   :  { %1262 = vmatpush.msra.mxu0 %v3766_v51 }
 0x29a   :  { %v1054_v38 = vand.u32 4294901760, %v1053_v58 }
 0x29b   :  { %1268 = vmatpush.msra.mxu0 %v3778_v55 }
 0x29c   :  { %1055 = vmatmul.f32.vlgmr.msra.gmra.mxu2 %v1054_v38  ;;  %1129 = vmatmul.f32.vlgmr.msrb.gmra.mxu0 %v1052_v33 }
 0x29d   :  { %1213 = vmatpush.msra.mxu2 %v3663_v15  ;;  %1274 = vmatpush.msra.mxu0 %v3798_v63 }
 0x29f   :  { %1215 = vmatpush.msra.mxu2 %v3672_v18  ;;  %1280 = vmatpush.msra.mxu0 %v3818_v7 }
 0x2a1   :  { %1217 = vmatpush.msra.mxu2 %v3690_v24  ;;  %1286 = vmatpush.msra.mxu0 %v3831_v25 }
 0x2a3   :  { %1219 = vmatpush.msra.mxu2 %v3703_v29  ;;  %1292 = vmatpush.msra.mxu0 %v3834_v26 }
 0x2a4   :  { %1105 = vmatmul.f32.vlgmr.msrb.gmra.mxu2 %v1051_v31 }
 0x2a5   :  { %1421 = vmatpush.msrb.mxu0 %v3663_v15  ;;  %1221 = vmatpush.msra.mxu2 %v3725_v37 }
 0x2a7   :  { %1423 = vmatpush.msrb.mxu0 %v3672_v18  ;;  %1223 = vmatpush.msra.mxu2 %v3746_v44 }
 0x2a9   :  { %1425 = vmatpush.msrb.mxu0 %v3690_v24  ;;  %1225 = vmatpush.msra.mxu2 %v3771_v53 }
 0x2ab   :  { %1427 = vmatpush.msrb.mxu0 %v3703_v29  ;;  %1227 = vmatpush.msra.mxu2 %v3782_v57 }
 0x2ad   :  { %1378 = vmatpush.msrb.mxu2 %v3683_v22  ;;  %1429 = vmatpush.msrb.mxu0 %v3725_v37 }
 0x2af   :  { %1382 = vmatpush.msrb.mxu2 %v3701_v28  ;;  %1431 = vmatpush.msrb.mxu0 %v3746_v44 }
 0x2b1   :  { %1386 = vmatpush.msrb.mxu2 %v3730_v39  ;;  %1433 = vmatpush.msrb.mxu0 %v3771_v53 }
 0x2b3   :  { %1390 = vmatpush.msrb.mxu2 %v3741_v41  ;;  %1435 = vmatpush.msrb.mxu0 %v3782_v57 }
 0x2b5   :  { %1394 = vmatpush.msrb.mxu2 %v3763_v42 }
 0x2b7   :  { %1398 = vmatpush.msrb.mxu2 %v3789_v59 }
 0x2b9   :  { %1402 = vmatpush.msrb.mxu2 %v3809_v4 }
 0x2bb   :  { %1406 = vmatpush.msrb.mxu2 %v3813_v5 }
 0x311   :  { %v1082_v1 = vpop.f32.mrf.mxu0 }
 0x312   :  { %v1176_v9 = vpop.f32.mrf.mxu1 }
 0x317   :  { %v1154_v56 = vpop.f32.mrf.mxu3 }
 0x319   :  { %v1130_v10 = vpop.f32.mrf.mxu0 }
 0x31f   :  { %v1056_v6 = vpop.f32.mrf.mxu2 }
 0x320   :  { %v1083_v46 = vadd.f32 %v1082_v1, %v1056_v6 }
 0x327   :  { %v1106_v49 = vpop.f32.mrf.mxu2 }
 0x328   :  { %v1107_v54 = vadd.f32 %v1106_v49, %v1083_v46 }
 0x32a   :  { %v1131_v11 = vadd.f32 %v1130_v10, %v1107_v54 }
 0x32c   :  { %v1155_v8 = vadd.f32 %v1154_v56, %v1131_v11 }
 0x32e   :  { %v1177_v12 = vadd.f32 %v1176_v9, %v1155_v8 }
 0x330   :  { %v1179_v20 = vperm.slane %v1177_v12, 0 }
 0x332   :  { %v3945_v50 = vsub.f32 %v3865_v27, %v1179_v20  ;;  %v3948_v3 = vsub.f32 %v3862_v13, %v1179_v20  ;;  %v3951_v2 = vsub.f32 %v3867_v35, %v1179_v20  ;;  %v3954_v21 = vsub.f32 %v3877_v47, %v1179_v20 }
 0x334   :  { %v1184_v30 = vmul.f32 %v3945_v50, %v3945_v50  ;;  %v1185_v31 = vmul.f32 %v3948_v3, %v3948_v3  ;;  %v1186_v33 = vmul.f32 %v3951_v2, %v3951_v2  ;;  %v1187_v27 = vmul.f32 %v3954_v21, %v3954_v21 }
 0x336   :  { %v1188_v13 = vsel %vm269_vm6, %v1184_v30, 0.0  ;;  %v1189_v35 = vsel %vm269_vm6, %v1185_v31, 0.0  ;;  %v1191_v47 = vsel %vm269_vm6, %v1186_v33, 0.0  ;;  %v1193_v1 = vsel %vm269_vm6, %v1187_v27, 0.0 }
 0x337   :  { %v1190_v58 = vadd.f32 %v1189_v35, %v1188_v13 }
 0x339   :  { %v1192_v38 = vadd.f32 %v1191_v47, %v1190_v58 }
 0x33b   :  { %v1194_v6 = vadd.f32 %v1193_v1, %v1192_v38 }
 0x33d   :  { %v1195_v46 = vrot.slane %v1194_v6, 4 }
 0x33f   :  { %v1196_v49 = vadd.f32 %v1195_v46, %v1194_v6 }
 0x341   :  { %v1197_v54 = vrot.slane %v1196_v49, 2 }
 0x343   :  { %v1198_v10 = vadd.f32 %v1197_v54, %v1196_v49 }
 0x345   :  { %v1199_v11 = vrot.slane %v1198_v10, 1 }
 0x347   :  { %v1200_v56 = vadd.f32 %v1199_v11, %v1198_v10 }
 0x349   :  { %v1202_v8 = vsel %vm269_vm6, %v1200_v56, 0 }
 0x34a   :  { %v1228_v9 = vand.u32 4294901760, %v1202_v8 }
 0x34c   :  { %1294 = vmatmul.f32.vlgmr.msra.gmra.mxu0 %v1228_v9  ;;  %v1229_v12 = vsub.f32 %v1202_v8, %v1228_v9 }
 0x34d   :  { %1597 = vmatpush.msra.mxu0 %v3757_v48 }
 0x34e   :  { %1332 = vmatmul.f32.vlgmr.msra.gmra.mxu3 %v1229_v12  ;;  %v1230_v20 = vand.u32 4294901760, %v1229_v12 }
 0x34f   :  { %1526 = vmatpush.msra.mxu3 %v3796_v62 }
 0x350   :  { %1363 = vmatmul.f32.vlgmr.msrb.gmra.mxu1 %v1230_v20  ;;  %v1231_v30 = vsub.f32 %v1229_v12, %v1230_v20 }
 0x351   :  { %1549 = vmatpush.msrb.mxu1 %v3757_v48 }
 0x352   :  { %v1232_v31 = vand.u32 4294901760, %v1231_v30  ;;  %v163_v30 = vld [vmem:[%s4249_s9] sm:$0x1] }
 0x354   :  { %1233 = vmatmul.f32.vlgmr.msra.gmra.mxu2 %v1232_v31  ;;  %1437 = vmatmul.f32.vlgmr.msrb.gmra.mxu0 %v1228_v9 }
 0x355   :  { %1575 = vmatpush.msra.mxu2 %v3824_v16  ;;  %1698 = vmatpush.msrb.mxu0 %v3757_v48 }
 0x35c   :  { %1408 = vmatmul.f32.vlgmr.msrb.gmra.mxu2 %v1228_v9 }
 0x35d   :  { %1675 = vmatpush.msrb.mxu2 %v3796_v62 }
 0x3c9   :  { %v1295_v33 = vpop.f32.mrf.mxu0 }
 0x3cd   :  { %v1364_v47 = vpop.f32.mrf.mxu1 }
 0x3d1   :  { %v1333_v35 = vpop.f32.mrf.mxu3  ;;  %v1438_v46 = vpop.f32.mrf.mxu0 }
 0x3d7   :  { %v1234_v27 = vpop.f32.mrf.mxu2 }
 0x3d8   :  { %v1296_v13 = vadd.f32 %v1295_v33, %v1234_v27  ;;  %v164_v33 = vld [vmem:[%s4250_s10] sm:$0x1] }
 0x3da   :  { %v1334_v58 = vadd.f32 %v1333_v35, %v1296_v13  ;;  %v1604_v35 = vsel %vm1026_vm1, %v164_v33, 0 }
 0x3dc   :  { %v1365_v38 = vadd.f32 %v1364_v47, %v1334_v58 }
 0x3df   :  { %v1409_v1 = vpop.f32.mrf.mxu2 }
 0x3e0   :  { %v1410_v6 = vadd.f32 %v1409_v1, %v1365_v38  ;;  %v1623_v38 = vand.u32 4294901760, %v1604_v35 }
 0x3e2   :  { %v1439_v49 = vadd.f32 %v1438_v46, %v1410_v6  ;;  %v1624_v46 = vsub.f32 %v1604_v35, %v1623_v38  ;;  %v3381_v35 = vld [vmem:[%s4251_s6 + $0x58] sm:$0xff] }
 0x3e4   :  { %v1441_v54 = vmul.f32 %v1439_v49, %v3906_v19 }
 0x3e6   :  { %v1442_v10 = vadd.f32 1e-05, %v1441_v54  ;;  %v1625_v54 = vand.u32 4294901760, %v1624_v46 }
 0x3e8   :  { %3386 = vrsqrt.f32 %v1442_v10  ;;  %vm1449_vm3 = vweird.f32 %v1442_v10 }
 0x3ee   :  { %v3387_v11 = vpop.eup %3386 }
 0x3ef   :  { %v1444_v56 = vmul.f32 %v3387_v11, %v1442_v10  ;;  %vm1450_vm2 = vweird.f32 %v3387_v11  ;;  %v1626_v10 = vsub.f32 %v1624_v46, %v1625_v54 }
 0x3f0   :  { %vm1451_vm4 = vmor %vm1449_vm3, %vm1450_vm2 }
 0x3f1   :  { %v1445_v8 = vmul.f32 %v3387_v11, %v1444_v56 }
 0x3f3   :  { %v1446_v9 = vmul.f32 0.5, %v1445_v8 }
 0x3f5   :  { %v1447_v12 = vsub.f32 1.5, %v1446_v9  ;;  %v3377_v9 = vld [vmem:[%s4251_s6 + $0x38] sm:$0xff] }
 0x3f7   :  { %v1448_v20 = vmul.f32 %v3387_v11, %v1447_v12  ;;  %v3376_v12 = vld [vmem:[%s4251_s6 + $0x30] sm:$0xff] }
 0x3f9   :  { %v1452_v31 = vsel %vm1451_vm4, %v3387_v11, %v1448_v20  ;;  %v1627_v11 = vand.u32 4294901760, %v1626_v10 }
 0x3fa   :  { %v1453_v27 = vmul.f32 %v1452_v31, %v163_v30 }
 0x3fc   :  { %v1455_v13 = vsel %vm1026_vm1, %v1453_v27, 0  ;;  %v3375_v27 = vld [vmem:[%s4251_s6 + $0x28] sm:$0xff] }
 0x3fd   :  { %v1474_v58 = vand.u32 4294901760, %v1455_v13 }
 0x3ff   :  { %v1475_v47 = vsub.f32 %v1455_v13, %v1474_v58  ;;  %1505 = vmatmul.f32.vlgmr.msra.gmra.mxu1 %v1474_v58  ;;  %1577 = vmatmul.f32.vlgmr.msra.gmra.mxu2 %v1474_v58  ;;  %v3373_v13 = vld [vmem:[%s4251_s6 + $0x18] sm:$0xff] }
 0x400   :  { %1599 = vmatmul.f32.vlgmr.msra.gmra.mxu0 %v1474_v58  ;;  %1652 = vmatpush.msra.mxu1 %v3902_v45 }
 0x401   :  { %v1476_v1 = vand.u32 4294901760, %v1475_v47  ;;  %1887 = vmatpush.bf16.msra.mxu2 %v3377_v9  ;;  %1942 = vmatpush.bf16.msra.mxu0 %v3373_v13  ;;  %v3379_v9 = vld [vmem:[%s4251_s6 + $0x48] sm:$0xff] }
 0x403   :  { %v1477_v6 = vsub.f32 %v1475_v47, %v1476_v1 }
 0x405   :  { %v1478_v49 = vand.u32 4294901760, %v1477_v6  ;;  %1888 = vmatpush.bf16.msra.mxu2 %v3376_v12  ;;  %v3370_v12 = vld [vmem:[%s4251_s6] sm:$0xff] }
 0x407   :  { %1479 = vmatmul.f32.vlgmr.msrb.gmra.mxu3 %v1478_v49  ;;  %1553 = vmatmul.f32.vlgmr.msrb.gmra.mxu1 %v1476_v1  ;;  %v3380_v49 = vld [vmem:[%s4251_s6 + $0x50] sm:$0xff] }
 0x408   :  { %1622 = vmatpush.msrb.mxu3 %v3757_v48  ;;  %1678 = vmatmul.f32.vlgmr.msrb.gmra.mxu2 %v1624_v46 }
 0x409   :  { %1746 = vmatpush.msrb.mxu1 %v3757_v48  ;;  %1702 = vmatmul.f32.vlgmr.msrb.gmra.mxu0 %v1625_v54  ;;  %v3371_v54 = vld [vmem:[%s4251_s6 + $0x8] sm:$0xff] }
 0x40a   :  { %1889 = vmatpush.bf16.msra.mxu2 %v3375_v27 }
 0x40f   :  { %1529 = vmatmul.f32.vlgmr.msra.gmra.mxu3 %v1475_v47  ;;  %1654 = vmatmul.f32.vlgmr.msra.gmra.mxu1 %v1623_v38  ;;  %v3374_v47 = vld [vmem:[%s4251_s6 + $0x20] sm:$0xff] }
 0x410   :  { %1724 = vmatpush.msra.mxu3 %v3824_v16  ;;  %2104 = vmatpush.msra.mxu1 %v3663_v15 }
 0x411   :  { %1890 = vmatpush.bf16.msra.mxu2 %v3374_v47 }
 0x412   :  { %2106 = vmatpush.msra.mxu1 %v3672_v18 }
 0x414   :  { %2108 = vmatpush.msra.mxu1 %v3690_v24 }
 0x415   :  { %2199 = vmatpush.msrb.mxu2 %v3670_v17 }
 0x416   :  { %2110 = vmatpush.msra.mxu1 %v3703_v29 }
 0x417   :  { %1628 = vmatmul.f32.vlgmr.msrb.gmra.mxu3 %v1627_v11  ;;  %1748 = vmatmul.f32.vlgmr.msrb.gmra.mxu1 %v1623_v38 }
 0x418   :  { %2112 = vmatpush.msra.mxu1 %v3725_v37  ;;  %2060 = vmatpush.bf16.msrb.mxu3 %v3381_v35 }
 0x419   :  { %2202 = vmatpush.msrb.mxu2 %v3687_v23 }
 0x41a   :  { %2114 = vmatpush.msra.mxu1 %v3746_v44 }
 0x41b   :  { %2205 = vmatpush.msrb.mxu2 %v3711_v32 }
 0x41c   :  { %2116 = vmatpush.msra.mxu1 %v3771_v53  ;;  %2061 = vmatpush.bf16.msrb.mxu3 %v3380_v49 }
 0x41d   :  { %2208 = vmatpush.msrb.mxu2 %v3723_v36 }
 0x41e   :  { %2118 = vmatpush.msra.mxu1 %v3782_v57 }
 0x41f   :  { %1726 = vmatmul.f32.vlgmr.msra.gmra.mxu3 %v1623_v38  ;;  %v3372_v38 = vld [vmem:[%s4251_s6 + $0x10] sm:$0xff]  ;;  %2211 = vmatpush.msrb.mxu2 %v3744_v43 }
 0x420   :  { %2141 = vmatpush.msrb.mxu1 %v3718_v34  ;;  %1943 = vmatpush.bf16.msra.mxu0 %v3372_v38 }
 0x421   :  { %2062 = vmatpush.bf16.msrb.mxu3 %v3379_v9  ;;  %2214 = vmatpush.msrb.mxu2 %v3769_v52 }
 0x422   :  { %2147 = vmatpush.msrb.mxu1 %v3738_v40 }
 0x423   :  { %2217 = vmatpush.msrb.mxu2 %v3792_v61 }
 0x424   :  { %2153 = vmatpush.msrb.mxu1 %v3766_v51  ;;  %1944 = vmatpush.bf16.msra.mxu0 %v3371_v54 }
 0x425   :  { %2220 = vmatpush.msrb.mxu2 %v3801_v0 }
 0x426   :  { %2159 = vmatpush.msrb.mxu1 %v3778_v55 }
 0x428   :  { %2165 = vmatpush.msrb.mxu1 %v3798_v63  ;;  %1945 = vmatpush.bf16.msra.mxu0 %v3370_v12 }
 0x42a   :  { %2171 = vmatpush.msrb.mxu1 %v3818_v7 }
 0x42c   :  { %2177 = vmatpush.msrb.mxu1 %v3831_v25  ;;  %2236 = vmatpush.msrb.mxu0 %v3663_v15 }
 0x42e   :  { %2183 = vmatpush.msrb.mxu1 %v3834_v26  ;;  %2238 = vmatpush.msrb.mxu0 %v3672_v18 }
 0x430   :  { %2240 = vmatpush.msrb.mxu0 %v3690_v24 }
 0x432   :  { %2242 = vmatpush.msrb.mxu0 %v3703_v29 }
 0x434   :  { %2244 = vmatpush.msrb.mxu0 %v3725_v37 }
 0x436   :  { %2246 = vmatpush.msrb.mxu0 %v3746_v44 }
 0x438   :  { %2248 = vmatpush.msrb.mxu0 %v3771_v53 }
 0x43a   :  { %2250 = vmatpush.msrb.mxu0 %v3782_v57 }
 0x47c   :  { %v1506_v56 = vpop.f32.mrf.mxu1 }
 0x47d   :  { %v1600_v1 = vpop.f32.mrf.mxu0 }
 0x482   :  { %v1578_v31 = vpop.f32.mrf.mxu2 }
 0x484   :  { %v1554_v20 = vpop.f32.mrf.mxu1 }
 0x48a   :  { %v1480_v8 = vpop.f32.mrf.mxu3 }
 0x48b   :  { %v1507_v30 = vadd.f32 %v1506_v56, %v1480_v8  ;;  %v1679_v56 = vpop.f32.mrf.mxu2 }
 0x48c   :  { %v1655_v46 = vpop.f32.mrf.mxu1 }
 0x492   :  { %v1530_v33 = vpop.f32.mrf.mxu3 }
 0x493   :  { %v1531_v58 = vadd.f32 %v1530_v33, %v1507_v30  ;;  %v3378_v33 = vld [vmem:[%s4251_s6 + $0x40] sm:$0xff] }
 0x494   :  { %2063 = vmatpush.bf16.msrb.mxu3 %v3378_v33 }
 0x495   :  { %v1555_v6 = vadd.f32 %v1554_v20, %v1531_v58  ;;  %v1749_v58 = vpop.f32.mrf.mxu1 }
 0x497   :  { %v1579_v10 = vadd.f32 %v1578_v31, %v1555_v6  ;;  %v1703_v31 = vpop.f32.mrf.mxu0 }
 0x498   :  { %2269 = vmatpush.msra.mxu3 %v3683_v22 }
 0x499   :  { %v1601_v30 = vadd.f32 %v1600_v1, %v1579_v10 }
 0x49a   :  { %v1629_v11 = vpop.f32.mrf.mxu3  ;;  %2273 = vmatpush.msra.mxu3 %v3701_v28 }
 0x49b   :  { %v1656_v8 = vadd.f32 %v1655_v46, %v1629_v11  ;;  %v1752_v13 = vperm.slane %v1601_v30, 0 }
 0x49c   :  { %2277 = vmatpush.msra.mxu3 %v3730_v39 }
 0x49d   :  { %v1680_v20 = vadd.f32 %v1679_v56, %v1656_v8  ;;  %v1753_v1 = vmul.f32 %v1752_v13, %v3945_v50  ;;  %v1754_v6 = vmul.f32 %v1752_v13, %v3948_v3  ;;  %v1755_v46 = vmul.f32 %v1752_v13, %v3951_v2 }
 0x49e   :  { %v1756_v49 = vmul.f32 %v1752_v13, %v3954_v21  ;;  %2281 = vmatpush.msra.mxu3 %v3741_v41 }
 0x49f   :  { %v1704_v27 = vadd.f32 %v1703_v31, %v1680_v20  ;;  %v1776_v31 = vld [vmem:[#allocation3] sm:$0x8] }
 0x4a0   :  { %2285 = vmatpush.msra.mxu3 %v3763_v42  ;;  %v1783_v33 = vshrl.u32 %v1776_v31, 16 }
 0x4a2   :  { %v1727_v35 = vpop.f32.mrf.mxu3  ;;  %2289 = vmatpush.msra.mxu3 %v3789_v59 }
 0x4a3   :  { %v1728_v47 = vadd.f32 %v1727_v35, %v1704_v27  ;;  %v1959_v27 = vld [vmem:[#allocation3 + $0xc] sm:$0x1] }
 0x4a4   :  { %2293 = vmatpush.msra.mxu3 %v3809_v4 }
 0x4a5   :  { %v1750_v38 = vadd.f32 %v1749_v58, %v1728_v47 }
 0x4a6   :  { %2297 = vmatpush.msra.mxu3 %v3813_v5 }
 0x4a7   :  { %v1757_v54 = vperm.slane %v1750_v38, 0  ;;  %v3256_v38 = vrot.slane %v1783_v33, 11 }
 0x4a9   :  { %v1758_v10 = vadd.f32 %v1757_v54, %v1753_v1  ;;  %v1759_v11 = vadd.f32 %v1757_v54, %v1754_v6  ;;  %v1760_v50 = vadd.f32 %v1757_v54, %v1755_v46  ;;  %v1761_v56 = vadd.f32 %v1757_v54, %v1756_v49 }
 0x4ab   :  { %v1762_v3 = vmax.f32 %v1758_v10, 0.0  ;;  %v1763_v8 = vmax.f32 %v1759_v11, 0.0  ;;  %v1764_v2 = vmax.f32 %v1760_v50, 0.0  ;;  %v1765_v9 = vmax.f32 %v1761_v56, 0.0 }
 0x4ac   :  { %v1983_v11 = vshll.u32 %v1959_v27, 16 }
 0x4ad   :  { %v1766_v21 = vpack.c.bf16 %v1762_v3, %v1762_v3  ;;  %v1767_v12 = vpack.c.bf16 %v1763_v8, %v1763_v8  ;;  %v1768_v20 = vpack.c.bf16 %v1764_v2, %v1764_v2  ;;  %v1769_v30 = vpack.c.bf16 %v1765_v9, %v1765_v9 }
 0x4af   :  { %1770 = vst.msk [vmem:[#allocation3 + $0x4] sm:$0xf] %vm128_vm5, %v1766_v21 }
 0x4b0   :  { %1771 = vst.msk [vmem:[#allocation3 + $0x8] sm:$0xf] %vm128_vm5, %v1767_v12 }
 0x4b1   :  { %1772 = vst.msk [vmem:[#allocation3 + $0x14] sm:$0xf] %vm128_vm5, %v1768_v20 }
 0x4b2   :  { %1773 = vst.msk [vmem:[#allocation3 + $0x18] sm:$0xf] %vm128_vm5, %v1769_v30 }
 0x4b6   :  { %v1777_v13 = vld [vmem:[#allocation3 + $0x4] sm:$0xf] }
 0x4b7   :  { %v1957_v35 = vld [vmem:[#allocation3 + $0x4] sm:$0xf]  ;;  %v1778_v47 = vld [vmem:[#allocation3 + $0x8] sm:$0xf]  ;;  %v1788_v1 = vshrl.u32 %v1777_v13, 16  ;;  %v1791_v46 = vshll.u32 %v1777_v13, 16 }
 0x4b8   :  { %v3368_v58 = vld [vmem:[#allocation3 + $0x4] sm:$0xff]  ;;  %v1964_v6 = vshrl.u32 %v1957_v35, 16  ;;  %v1797_v49 = vshrl.u32 %v1778_v47, 16  ;;  %v1967_v10 = vshll.u32 %v1957_v35, 16  ;;  %v1800_v9 = vshll.u32 %v1778_v47, 16 }
 0x4b9   :  { %v1958_v54 = vld [vmem:[#allocation3 + $0x8] sm:$0xf]  ;;  %3290 = vmatmul.msk.bf16.vlgmr.msra.gmra.mxu2 %vm269_vm6, %v3368_v58  ;;  %v1790_v50 = vrot.slane %v1788_v1, 7  ;;  %v1780_v12 = vld [vmem:[#allocation3 + $0x14] sm:$0xf] }
 0x4ba   :  { %v1966_v56 = vrot.slane %v1964_v6, 4  ;;  %v1973_v3 = vshll.u32 %v1958_v54, 16  ;;  %v1977_v8 = vshrl.u32 %v1958_v54, 16  ;;  %v1799_v2 = vrot.slane %v1797_v49, 7  ;;  %2352 = vmatpush.msra.mxu2 %v3757_v48  ;;  %v1781_v13 = vld [vmem:[#allocation3 + $0x18] sm:$0xf] }
 0x4bb   :  { %v1969_v21 = vrot.slane %v1967_v10, 5  ;;  %v1793_v20 = vor.u32 %v1791_v46, %v1790_v50  ;;  %v1795_v30 = vrot.slane %v1790_v50, 4  ;;  %v1960_v27 = vld [vmem:[#allocation3 + $0x14] sm:$0xf]  ;;  %v1985_v6 = vrot.slane %v1983_v11, 5 }
 0x4bc   :  { %v1975_v31 = vrot.slane %v1973_v3, 5  ;;  %v1979_v33 = vrot.slane %v1977_v8, 4  ;;  %v1802_v0 = vor.u32 %v1800_v9, %v1799_v2  ;;  %v1779_v54 = vld [vmem:[#allocation3 + $0x10] sm:$0x8]  ;;  %v1810_v49 = vshrl.u32 %v1780_v12, 16 }
 0x4bd   :  { %v1970_v35 = vor.u32 %v1969_v21, %v1966_v56  ;;  %v1794_v58 = vsel %vm3556_vm11, %v3256_v38, %v1793_v20  ;;  %v1819_v46 = vshrl.u32 %v1781_v13, 16  ;;  %v1988_v8 = vshrl.u32 %v1960_v27, 16  ;;  %v1961_v9 = vld [vmem:[#allocation3 + $0x18] sm:$0xf] }
 0x4be   :  { %v1980_v1 = vor.u32 %v1979_v33, %v1975_v31  ;;  %v1803_v47 = vsel %vm3556_vm11, %v1795_v30, %v1802_v0  ;;  %v1902_v10 = vunpack.c.l.b16 %v1794_v58  ;;  %v1805_v2 = vshrl.u32 %v1779_v54, 16  ;;  %v1962_v30 = vld [vmem:[#allocation3 + $0x1c] sm:$0x1] }
 0x4bf   :  { %v1971_v5 = vrot.slane %v1970_v35, 4  ;;  %v1903_v50 = vunpack.c.l.b16 %v1803_v47  ;;  %v1991_v21 = vshll.u32 %v1960_v27, 16  ;;  %v1812_v33 = vrot.slane %v1810_v49, 7 }
 0x4c0   :  { %v1981_v3 = vrot.slane %v1980_v1, 4  ;;  %v1821_v0 = vrot.slane %v1819_v46, 7  ;;  %v1990_v35 = vrot.slane %v1988_v8, 4  ;;  %v1997_v1 = vshll.u32 %v1961_v9, 16  ;;  %v3369_v8 = vld [vmem:[#allocation3 + $0x14] sm:$0xff] }
 0x4c1   :  { %v1976_v56 = vsel %vm3576_vm12, %v1971_v5, %v1975_v31  ;;  %v1906_v38 = vpack.c.b16 %v1903_v50, %v1902_v10  ;;  %v1993_v58 = vrot.slane %v1991_v21, 5  ;;  %v2001_v47 = vshrl.u32 %v1961_v9, 16 }
 0x4c2   :  { %v1986_v11 = vsel %vm3576_vm12, %v1981_v3, %v1985_v6  ;;  %v2020_v20 = vunpack.c.l.b16 %v1976_v56  ;;  %v1813_v5 = vshll.u32 %v1780_v12, 16  ;;  %v1822_v31 = vshll.u32 %v1781_v13, 16 }
 0x4c3   :  { %v2021_v61 = vunpack.c.l.b16 %v1986_v11  ;;  %3308 = vmatmul.msk.bf16.vlgmr.msra.gmra.mxu0 %vm269_vm6, %v1906_v38  ;;  %v1994_v27 = vor.u32 %v1993_v58, %v1990_v35  ;;  %v1999_v54 = vrot.slane %v1997_v1, 5  ;;  %v2003_v10 = vrot.slane %v2001_v47, 4 }
 0x4c4   :  { %2382 = vmatpush.msra.mxu0 %v3902_v45  ;;  %v2007_v6 = vshll.u32 %v1962_v30, 16  ;;  %v3257_v49 = vrot.slane %v1805_v2, 11  ;;  %v1815_v46 = vor.u32 %v1813_v5, %v1812_v33  ;;  %v1817_v50 = vrot.slane %v1812_v33, 4 }
 0x4c5   :  { %v2024_v4 = vpack.c.b16 %v2021_v61, %v2020_v20  ;;  %v1824_v3 = vor.u32 %v1822_v31, %v1821_v0  ;;  %v2004_v56 = vor.u32 %v2003_v10, %v1999_v54  ;;  %v1995_v61 = vrot.slane %v1994_v27, 4 }
 0x4c6   :  { %v2009_v13 = vrot.slane %v2007_v6, 5  ;;  %v1816_v9 = vsel %vm3556_vm11, %v3257_v49, %v1815_v46 }
 0x4c7   :  { %3334 = vmatmul.msk.bf16.vlgmr.msrb.gmra.mxu3 %vm269_vm6, %v2024_v4  ;;  %v2005_v12 = vrot.slane %v2004_v56, 4  ;;  %v1825_v21 = vsel %vm3556_vm11, %v1817_v50, %v1824_v3  ;;  %v1904_v4 = vunpack.c.l.b16 %v1816_v9  ;;  %v2000_v38 = vsel %vm3576_vm12, %v1995_v61, %v1999_v54 }
 0x4c8   :  { %2405 = vmatpush.msrb.mxu3 %v3796_v62  ;;  %v1905_v2 = vunpack.c.l.b16 %v1825_v21  ;;  %v2022_v20 = vunpack.c.l.b16 %v2000_v38 }
 0x4c9   :  { %3291 = vmatmul.msk.bf16.gmra.mxu2 %vm269_vm6, %v3369_v8  ;;  %v2010_v11 = vsel %vm3576_vm12, %v2005_v12, %v2009_v13 }
 0x4ca   :  { %v2023_v33 = vunpack.c.l.b16 %v2010_v11  ;;  %v1907_v0 = vpack.c.b16 %v1905_v2, %v1904_v4 }
 0x4cc   :  { %v2025_v30 = vpack.c.b16 %v2023_v33, %v2022_v20 }
 0x4d3   :  { %3309 = vmatmul.msk.bf16.gmra.mxu0 %vm269_vm6, %v1907_v0 }
 0x4d7   :  { %3335 = vmatmul.msk.bf16.gmra.mxu3 %vm269_vm6, %v2025_v30 }
 0x53c   :  { %v1892_v58 = vpop.f32.mrf.mxu2 }
 0x540   :  { %v1947_v35 = vpop.f32.mrf.mxu0 }
 0x541   :  { %v1948_v14 = vadd.f32 %v1947_v35, %v1892_v58 }
 0x544   :  { %v1894_v47 = vpop.f32.mrf.mxu2 }
 0x548   :  { %v1949_v60 = vpop.f32.mrf.mxu0 }
 0x549   :  { %v1950_v54 = vadd.f32 %v1949_v60, %v1894_v47 }
 0x54a   :  { %v2065_v1 = vpop.f32.mrf.mxu3 }
 0x54b   :  { %v4099_v46 = vadd.f32 %v2065_v1, %v1948_v14 }
 0x54c   :  { %v1897_v27 = vpop.f32.mrf.mxu2 }
 0x54d   :  { %v2079_v61 = vsel %vm269_vm6, %v4099_v46, 0.0 }
 0x550   :  { %v1952_v31 = vpop.f32.mrf.mxu0 }
 0x551   :  { %v1953_v6 = vadd.f32 %v1952_v31, %v1897_v27 }
 0x552   :  { %v2067_v5 = vpop.f32.mrf.mxu3 }
 0x553   :  { %v4097_v49 = vadd.f32 %v2067_v5, %v1950_v54 }
 0x554   :  { %v1899_v56 = vpop.f32.mrf.mxu2 }
 0x555   :  { %v2080_v8 = vsel %vm269_vm6, %v4097_v49, 0.0 }
 0x556   :  { %v2081_v9 = vadd.f32 %v2080_v8, %v2079_v61 }
 0x558   :  { %v1954_v3 = vpop.f32.mrf.mxu0 }
 0x559   :  { %v1955_v12 = vadd.f32 %v1954_v3, %v1899_v56 }
 0x55a   :  { %v2070_v10 = vpop.f32.mrf.mxu3 }
 0x55b   :  { %v4101_v50 = vadd.f32 %v2070_v10, %v1953_v6 }
 0x55d   :  { %v2082_v13 = vsel %vm269_vm6, %v4101_v50, 0.0 }
 0x55e   :  { %v2083_v2 = vadd.f32 %v2082_v13, %v2081_v9 }
 0x562   :  { %v2072_v21 = vpop.f32.mrf.mxu3 }
 0x563   :  { %v4109_v4 = vadd.f32 %v2072_v21, %v1955_v12 }
 0x565   :  { %v2084_v38 = vsel %vm269_vm6, %v4109_v4, 0.0 }
 0x566   :  { %v2085_v11 = vadd.f32 %v2084_v38, %v2083_v2 }
 0x568   :  { %v2086_v20 = vrot.slane %v2085_v11, 4 }
 0x56a   :  { %v2087_v33 = vadd.f32 %v2086_v20, %v2085_v11 }
 0x56c   :  { %v2088_v0 = vrot.slane %v2087_v33, 2 }
 0x56e   :  { %v2089_v30 = vadd.f32 %v2088_v0, %v2087_v33 }
 0x570   :  { %v2090_v35 = vrot.slane %v2089_v30, 1 }
 0x572   :  { %v2091_v58 = vadd.f32 %v2090_v35, %v2089_v30 }
 0x574   :  { %v2093_v60 = vsel %vm269_vm6, %v2091_v58, 0 }
 0x575   :  { %v2119_v1 = vand.u32 4294901760, %v2093_v60 }
 0x577   :  { %2299 = vmatmul.f32.vlgmr.msra.gmra.mxu3 %v2119_v1  ;;  %v2120_v47 = vsub.f32 %v2093_v60, %v2119_v1 }
 0x578   :  { %2516 = vmatpush.msra.mxu3 %v3663_v15 }
 0x579   :  { %2223 = vmatmul.f32.vlgmr.msrb.gmra.mxu2 %v2120_v47  ;;  %v2121_v5 = vand.u32 4294901760, %v2120_v47 }
 0x57a   :  { %2454 = vmatpush.msrb.mxu2 %v3824_v16  ;;  %2518 = vmatpush.msra.mxu3 %v3672_v18 }
 0x57b   :  { %2254 = vmatmul.f32.vlgmr.msrb.gmra.mxu0 %v2121_v5  ;;  %v2122_v31 = vsub.f32 %v2120_v47, %v2121_v5 }
 0x57c   :  { %2476 = vmatpush.msrb.mxu0 %v3757_v48  ;;  %2520 = vmatpush.msra.mxu3 %v3690_v24 }
 0x57d   :  { %v2123_v27 = vand.u32 4294901760, %v2122_v31 }
 0x57e   :  { %2522 = vmatpush.msra.mxu3 %v3703_v29 }
 0x57f   :  { %2124 = vmatmul.f32.vlgmr.msra.gmra.mxu1 %v2123_v27 }
 0x580   :  { %2312 = vmatpush.msra.mxu1 %v3663_v15  ;;  %2524 = vmatpush.msra.mxu3 %v3725_v37 }
 0x582   :  { %2314 = vmatpush.msra.mxu1 %v3672_v18  ;;  %2526 = vmatpush.msra.mxu3 %v3746_v44 }
 0x584   :  { %2316 = vmatpush.msra.mxu1 %v3690_v24  ;;  %2528 = vmatpush.msra.mxu3 %v3771_v53 }
 0x586   :  { %2318 = vmatpush.msra.mxu1 %v3703_v29  ;;  %2530 = vmatpush.msra.mxu3 %v3782_v57 }
 0x587   :  { %2185 = vmatmul.f32.vlgmr.msrb.gmra.mxu1 %v2119_v1 }
 0x588   :  { %2320 = vmatpush.msra.mxu1 %v3725_v37 }
 0x58a   :  { %2322 = vmatpush.msra.mxu1 %v3746_v44 }
 0x58c   :  { %2324 = vmatpush.msra.mxu1 %v3771_v53 }
 0x58e   :  { %2326 = vmatpush.msra.mxu1 %v3782_v57 }
 0x58f   :  { %2328 = vmatmul.f32.vlgmr.msra.gmra.mxu1 %v2119_v1 }
 0x590   :  { %2428 = vmatpush.msrb.mxu1 %v3757_v48 }
 0x592   :  { %2553 = vmatpush.msra.mxu1 %v3718_v34 }
 0x594   :  { %2559 = vmatpush.msra.mxu1 %v3738_v40 }
 0x596   :  { %2565 = vmatpush.msra.mxu1 %v3766_v51 }
 0x598   :  { %2571 = vmatpush.msra.mxu1 %v3778_v55 }
 0x59a   :  { %2577 = vmatpush.msra.mxu1 %v3798_v63 }
 0x59c   :  { %2583 = vmatpush.msra.mxu1 %v3818_v7 }
 0x59e   :  { %2589 = vmatpush.msra.mxu1 %v3831_v25 }
 0x5a0   :  { %2595 = vmatpush.msra.mxu1 %v3834_v26 }
 0x5f8   :  { %v2255_v34 = vpop.f32.mrf.mxu0 }
 0x5fa   :  { %v2300_v40 = vpop.f32.mrf.mxu3 }
 0x5fc   :  { %v2125_v54 = vpop.f32.mrf.mxu1  ;;  %v2224_v6 = vpop.f32.mrf.mxu2 }
 0x604   :  { %v2186_v10 = vpop.f32.mrf.mxu1 }
 0x605   :  { %v2187_v14 = vadd.f32 %v2186_v10, %v2125_v54 }
 0x607   :  { %v2225_v3 = vadd.f32 %v2224_v6, %v2187_v14 }
 0x609   :  { %v2256_v8 = vadd.f32 %v2255_v34, %v2225_v3 }
 0x60b   :  { %v2301_v56 = vadd.f32 %v2300_v40, %v2256_v8 }
 0x60c   :  { %v2329_v51 = vpop.f32.mrf.mxu1 }
 0x60d   :  { %v2330_v61 = vadd.f32 %v2329_v51, %v2301_v56 }
 0x60f   :  { %v2332_v55 = vmul.f32 %v2330_v61, %v3906_v19 }
 0x611   :  { %v2334_v63 = vsel %vm1026_vm1, %v2332_v55, 0 }
 0x612   :  { %v2353_v7 = vand.u32 4294901760, %v2334_v63 }
 0x614   :  { %v2354_v12 = vsub.f32 %v2334_v63, %v2353_v7  ;;  %2384 = vmatmul.f32.vlgmr.msra.gmra.mxu0 %v2353_v7 }
 0x615   :  { %2648 = vmatpush.msra.mxu0 %v3663_v15 }
 0x616   :  { %2408 = vmatmul.f32.vlgmr.msrb.gmra.mxu3 %v2354_v12  ;;  %v2355_v25 = vand.u32 4294901760, %v2354_v12 }
 0x617   :  { %2650 = vmatpush.msra.mxu0 %v3672_v18  ;;  %2681 = vmatpush.msrb.mxu3 %v3683_v22  ;;  %v4272_v22 = vld [vmem:[#allocation5_spill] sm:$0xff] }
 0x618   :  { %2432 = vmatmul.f32.vlgmr.msrb.gmra.mxu1 %v2355_v25  ;;  %v2356_v26 = vsub.f32 %v2354_v12, %v2355_v25 }
 0x619   :  { %2652 = vmatpush.msra.mxu0 %v3690_v24  ;;  %2724 = vmatpush.msrb.mxu1 %v3663_v15  ;;  %v4269_v15 = vld [vmem:[#allocation6_spill] sm:$0xff] }
 0x61a   :  { %v2357_v13 = vand.u32 4294901760, %v2356_v26  ;;  %2685 = vmatpush.msrb.mxu3 %v3701_v28 }
 0x61b   :  { %2654 = vmatpush.msra.mxu0 %v3703_v29  ;;  %2726 = vmatpush.msrb.mxu1 %v3672_v18  ;;  %v4271_v18 = vld [vmem:[#allocation7_spill] sm:$0xff] }
 0x61c   :  { %2358 = vmatmul.f32.vlgmr.msra.gmra.mxu2 %v2357_v13  ;;  %2478 = vmatmul.f32.vlgmr.msrb.gmra.mxu0 %v2353_v7 }
 0x61d   :  { %2611 = vmatpush.msra.mxu2 %v3670_v17  ;;  %2656 = vmatpush.msra.mxu0 %v3725_v37  ;;  %v4270_v17 = vld [vmem:[#allocation4_spill] sm:$0xff] }
 0x61e   :  { %2728 = vmatpush.msrb.mxu1 %v3690_v24  ;;  %2689 = vmatpush.msrb.mxu3 %v3730_v39 }
 0x61f   :  { %2614 = vmatpush.msra.mxu2 %v3687_v23  ;;  %2658 = vmatpush.msra.mxu0 %v3746_v44 }
 0x620   :  { %2730 = vmatpush.msrb.mxu1 %v3703_v29  ;;  %2693 = vmatpush.msrb.mxu3 %v3741_v41 }
 0x621   :  { %2617 = vmatpush.msra.mxu2 %v3711_v32  ;;  %2660 = vmatpush.msra.mxu0 %v3771_v53 }
 0x622   :  { %2732 = vmatpush.msrb.mxu1 %v3725_v37  ;;  %2697 = vmatpush.msrb.mxu3 %v3763_v42 }
 0x623   :  { %2620 = vmatpush.msra.mxu2 %v3723_v36  ;;  %2662 = vmatpush.msra.mxu0 %v3782_v57 }
 0x624   :  { %2456 = vmatmul.f32.vlgmr.msrb.gmra.mxu2 %v2353_v7  ;;  %2734 = vmatpush.msrb.mxu1 %v3746_v44 }
 0x625   :  { %2623 = vmatpush.msra.mxu2 %v3744_v43  ;;  %2701 = vmatpush.msrb.mxu3 %v3789_v59 }
 0x626   :  { %2736 = vmatpush.msrb.mxu1 %v3771_v53  ;;  %2806 = vmatpush.msrb.mxu0 %v3902_v45 }
 0x627   :  { %2626 = vmatpush.msra.mxu2 %v3769_v52  ;;  %2705 = vmatpush.msrb.mxu3 %v4269_v15 }
 0x628   :  { %2738 = vmatpush.msrb.mxu1 %v3782_v57 }
 0x629   :  { %2629 = vmatpush.msra.mxu2 %v4270_v17  ;;  %2709 = vmatpush.msrb.mxu3 %v4271_v18  ;;  %v1774_v18 = vld [vmem:[%s4252_s11] sm:$0x1] }
 0x62b   :  { %2632 = vmatpush.msra.mxu2 %v4272_v22 }
 0x62d   :  { %2776 = vmatpush.msrb.mxu2 %v3757_v48 }
 0x691   :  { %v2385_v23 = vpop.f32.mrf.mxu0 }
 0x695   :  { %v2433_v36 = vpop.f32.mrf.mxu1 }
 0x699   :  { %v2409_v29 = vpop.f32.mrf.mxu3  ;;  %v2479_v43 = vpop.f32.mrf.mxu0 }
 0x69f   :  { %v2359_v24 = vpop.f32.mrf.mxu2 }
 0x6a0   :  { %v2386_v28 = vadd.f32 %v2385_v23, %v2359_v24 }
 0x6a2   :  { %v2410_v32 = vadd.f32 %v2409_v29, %v2386_v28 }
 0x6a4   :  { %v2434_v37 = vadd.f32 %v2433_v36, %v2410_v32 }
 0x6a7   :  { %v2457_v39 = vpop.f32.mrf.mxu2 }
 0x6a8   :  { %v2458_v41 = vadd.f32 %v2457_v39, %v2434_v37 }
 0x6aa   :  { %v2480_v44 = vadd.f32 %v2479_v43, %v2458_v41 }
 0x6ac   :  { %v2482_v42 = vperm.slane %v2480_v44, 0 }
 0x6ae   :  { %v4178_v52 = vsub.f32 %v4099_v46, %v2482_v42  ;;  %v4181_v53 = vsub.f32 %v4097_v49, %v2482_v42  ;;  %v4184_v57 = vsub.f32 %v4101_v50, %v2482_v42  ;;  %v4187_v59 = vsub.f32 %v4109_v4, %v2482_v42 }
 0x6b0   :  { %v2487_v9 = vmul.f32 %v4178_v52, %v4178_v52  ;;  %v2488_v21 = vmul.f32 %v4181_v53, %v4181_v53  ;;  %v2489_v2 = vmul.f32 %v4184_v57, %v4184_v57  ;;  %v2490_v46 = vmul.f32 %v4187_v59, %v4187_v59 }
 0x6b2   :  { %v2491_v49 = vsel %vm269_vm6, %v2487_v9, 0.0  ;;  %v2492_v50 = vsel %vm269_vm6, %v2488_v21, 0.0  ;;  %v2494_v4 = vsel %vm269_vm6, %v2489_v2, 0.0  ;;  %v2496_v20 = vsel %vm269_vm6, %v2490_v46, 0.0 }
 0x6b3   :  { %v2493_v38 = vadd.f32 %v2492_v50, %v2491_v49 }
 0x6b5   :  { %v2495_v11 = vadd.f32 %v2494_v4, %v2493_v38 }
 0x6b7   :  { %v2497_v33 = vadd.f32 %v2496_v20, %v2495_v11 }
 0x6b9   :  { %v2498_v0 = vrot.slane %v2497_v33, 4 }
 0x6bb   :  { %v2499_v30 = vadd.f32 %v2498_v0, %v2497_v33 }
 0x6bd   :  { %v2500_v35 = vrot.slane %v2499_v30, 2 }
 0x6bf   :  { %v2501_v58 = vadd.f32 %v2500_v35, %v2499_v30 }
 0x6c1   :  { %v2502_v60 = vrot.slane %v2501_v58, 1 }
 0x6c3   :  { %v2503_v1 = vadd.f32 %v2502_v60, %v2501_v58 }
 0x6c5   :  { %v2505_v47 = vsel %vm269_vm6, %v2503_v1, 0 }
 0x6c6   :  { %v2531_v5 = vand.u32 4294901760, %v2505_v47 }
 0x6c8   :  { %2597 = vmatmul.f32.vlgmr.msra.gmra.mxu1 %v2531_v5  ;;  %v2532_v31 = vsub.f32 %v2505_v47, %v2531_v5 }
 0x6c9   :  { %2900 = vmatpush.msra.mxu1 %v3757_v48 }
 0x6ca   :  { %2635 = vmatmul.f32.vlgmr.msra.gmra.mxu2 %v2532_v31  ;;  %v2533_v27 = vand.u32 4294901760, %v2532_v31 }
 0x6cb   :  { %2829 = vmatpush.msra.mxu2 %v3796_v62 }
 0x6cc   :  { %2666 = vmatmul.f32.vlgmr.msra.gmra.mxu0 %v2533_v27  ;;  %v2534_v54 = vsub.f32 %v2532_v31, %v2533_v27 }
 0x6cd   :  { %2852 = vmatpush.msra.mxu0 %v3757_v48 }
 0x6ce   :  { %v2535_v10 = vand.u32 4294901760, %v2534_v54 }
 0x6d0   :  { %2536 = vmatmul.f32.vlgmr.msra.gmra.mxu3 %v2535_v10  ;;  %2740 = vmatmul.f32.vlgmr.msrb.gmra.mxu1 %v2531_v5 }
 0x6d1   :  { %2878 = vmatpush.msra.mxu3 %v3824_v16  ;;  %3001 = vmatpush.msrb.mxu1 %v3757_v48 }
 0x6d8   :  { %2711 = vmatmul.f32.vlgmr.msrb.gmra.mxu3 %v2531_v5 }
 0x6d9   :  { %2978 = vmatpush.msrb.mxu3 %v3796_v62 }
 0x745   :  { %v2598_v14 = vpop.f32.mrf.mxu1 }
 0x749   :  { %v2667_v40 = vpop.f32.mrf.mxu0 }
 0x74d   :  { %v2636_v34 = vpop.f32.mrf.mxu2  ;;  %v2741_v55 = vpop.f32.mrf.mxu1 }
 0x753   :  { %v2537_v6 = vpop.f32.mrf.mxu3 }
 0x754   :  { %v2599_v3 = vadd.f32 %v2598_v14, %v2537_v6 }
 0x756   :  { %v2637_v8 = vadd.f32 %v2636_v34, %v2599_v3 }
 0x758   :  { %v2668_v56 = vadd.f32 %v2667_v40, %v2637_v8 }
 0x75b   :  { %v2712_v51 = vpop.f32.mrf.mxu3 }
 0x75c   :  { %v2713_v61 = vadd.f32 %v2712_v51, %v2668_v56 }
 0x75e   :  { %v2742_v63 = vadd.f32 %v2741_v55, %v2713_v61 }
 0x760   :  { %v2744_v7 = vmul.f32 %v2742_v63, %v3906_v19  ;;  %v1775_v19 = vld [vmem:[%s4253_s12] sm:$0x1] }
 0x761   :  { %v2907_v28 = vsel %vm1026_vm1, %v1775_v19, 0 }
 0x762   :  { %v2745_v12 = vadd.f32 1e-05, %v2744_v7  ;;  %v2926_v36 = vand.u32 4294901760, %v2907_v28 }
 0x764   :  { %3388 = vrsqrt.f32 %v2745_v12  ;;  %vm2752_vm7 = vweird.f32 %v2745_v12  ;;  %v2927_v41 = vsub.f32 %v2907_v28, %v2926_v36 }
 0x766   :  { %v2928_v44 = vand.u32 4294901760, %v2927_v41 }
 0x768   :  { %v2929_v42 = vsub.f32 %v2927_v41, %v2928_v44 }
 0x76a   :  { %v3389_v25 = vpop.eup %3388  ;;  %v2930_v9 = vand.u32 4294901760, %v2929_v42 }
 0x76b   :  { %v2747_v26 = vmul.f32 %v3389_v25, %v2745_v12  ;;  %vm2753_vm5 = vweird.f32 %v3389_v25 }
 0x76c   :  { %vm2754_vm8 = vmor %vm2752_vm7, %vm2753_vm5 }
 0x76d   :  { %v2748_v13 = vmul.f32 %v3389_v25, %v2747_v26 }
 0x76f   :  { %v2749_v15 = vmul.f32 0.5, %v2748_v13 }
 0x771   :  { %v2750_v62 = vsub.f32 1.5, %v2749_v15 }
 0x773   :  { %v2751_v17 = vmul.f32 %v3389_v25, %v2750_v62 }
 0x775   :  { %v2755_v22 = vsel %vm2754_vm8, %v3389_v25, %v2751_v17 }
 0x776   :  { %v2756_v23 = vmul.f32 %v2755_v22, %v1774_v18 }
 0x778   :  { %v2758_v24 = vsel %vm1026_vm1, %v2756_v23, 0 }
 0x779   :  { %v2777_v29 = vand.u32 4294901760, %v2758_v24 }
 0x77b   :  { %v2778_v32 = vsub.f32 %v2758_v24, %v2777_v29  ;;  %2808 = vmatmul.f32.vlgmr.msrb.gmra.mxu0 %v2777_v29  ;;  %2880 = vmatmul.f32.vlgmr.msra.gmra.mxu3 %v2777_v29 }
 0x77c   :  { %2902 = vmatmul.f32.vlgmr.msra.gmra.mxu1 %v2777_v29  ;;  %2955 = vmatpush.msrb.mxu0 %v3902_v45 }
 0x77d   :  { %v2779_v37 = vand.u32 4294901760, %v2778_v32 }
 0x77f   :  { %v2780_v39 = vsub.f32 %v2778_v32, %v2779_v37 }
 0x781   :  { %v2781_v43 = vand.u32 4294901760, %v2780_v39 }
 0x783   :  { %2782 = vmatmul.f32.vlgmr.msrb.gmra.mxu2 %v2781_v43  ;;  %2856 = vmatmul.f32.vlgmr.msra.gmra.mxu0 %v2779_v37 }
 0x784   :  { %2925 = vmatpush.msrb.mxu2 %v3757_v48  ;;  %2981 = vmatmul.f32.vlgmr.msrb.gmra.mxu3 %v2927_v41 }
 0x785   :  { %3049 = vmatpush.msra.mxu0 %v3757_v48  ;;  %3005 = vmatmul.f32.vlgmr.msrb.gmra.mxu1 %v2928_v44 }
 0x78b   :  { %2832 = vmatmul.f32.vlgmr.msra.gmra.mxu2 %v2778_v32  ;;  %2957 = vmatmul.f32.vlgmr.msrb.gmra.mxu0 %v2926_v36 }
 0x78c   :  { %3027 = vmatpush.msra.mxu2 %v3824_v16 }
 0x793   :  { %2931 = vmatmul.f32.vlgmr.msrb.gmra.mxu2 %v2930_v9  ;;  %3051 = vmatmul.f32.vlgmr.msra.gmra.mxu0 %v2926_v36 }
 0x79b   :  { %3029 = vmatmul.f32.vlgmr.msra.gmra.mxu2 %v2926_v36 }
 0x7f8   :  { %v2809_v45 = vpop.f32.mrf.mxu0 }
 0x7f9   :  { %v2903_v4 = vpop.f32.mrf.mxu1 }
 0x7fe   :  { %v2881_v49 = vpop.f32.mrf.mxu3 }
 0x800   :  { %v2857_v2 = vpop.f32.mrf.mxu0 }
 0x802   :  { %v3006_v58 = vpop.f32.mrf.mxu1 }
 0x806   :  { %v2783_v21 = vpop.f32.mrf.mxu2 }
 0x807   :  { %v2810_v46 = vadd.f32 %v2809_v45, %v2783_v21  ;;  %v2982_v0 = vpop.f32.mrf.mxu3 }
 0x808   :  { %v2958_v48 = vpop.f32.mrf.mxu0 }
 0x80e   :  { %v2833_v50 = vpop.f32.mrf.mxu2 }
 0x80f   :  { %v2834_v38 = vadd.f32 %v2833_v50, %v2810_v46 }
 0x810   :  { %v3052_v5 = vpop.f32.mrf.mxu0 }
 0x811   :  { %v2858_v11 = vadd.f32 %v2857_v2, %v2834_v38 }
 0x813   :  { %v2882_v20 = vadd.f32 %v2881_v49, %v2858_v11 }
 0x815   :  { %v2904_v16 = vadd.f32 %v2903_v4, %v2882_v20 }
 0x816   :  { %v2932_v33 = vpop.f32.mrf.mxu2 }
 0x817   :  { %v2959_v30 = vadd.f32 %v2958_v48, %v2932_v33  ;;  %v3055_v1 = vperm.slane %v2904_v16, 0 }
 0x819   :  { %v2983_v35 = vadd.f32 %v2982_v0, %v2959_v30  ;;  %v3056_v54 = vmul.f32 %v3055_v1, %v4178_v52  ;;  %v3057_v10 = vmul.f32 %v3055_v1, %v4181_v53  ;;  %v3058_v14 = vmul.f32 %v3055_v1, %v4184_v57 }
 0x81a   :  { %v3059_v6 = vmul.f32 %v3055_v1, %v4187_v59 }
 0x81b   :  { %v3007_v60 = vadd.f32 %v3006_v58, %v2983_v35 }
 0x81e   :  { %v3030_v47 = vpop.f32.mrf.mxu2 }
 0x81f   :  { %v3031_v31 = vadd.f32 %v3030_v47, %v3007_v60 }
 0x821   :  { %v3053_v27 = vadd.f32 %v3052_v5, %v3031_v31 }
 0x823   :  { %v3060_v3 = vperm.slane %v3053_v27, 0 }
 0x825   :  { %v3061_v34 = vadd.f32 %v3060_v3, %v3056_v54  ;;  %v3062_v8 = vadd.f32 %v3060_v3, %v3057_v10  ;;  %v3063_v40 = vadd.f32 %v3060_v3, %v3058_v14  ;;  %v3064_v56 = vadd.f32 %v3060_v3, %v3059_v6 }
 0x827   :  { %v3065_v51 = vmax.f32 %v3061_v34, 0.0  ;;  %v3066_v61 = vmax.f32 %v3062_v8, 0.0  ;;  %v3067_v55 = vmax.f32 %v3063_v40, 0.0  ;;  %v3068_v63 = vmax.f32 %v3064_v56, 0.0 }
 0x829   :  { %3069 = vst.msk [vmem:[%s4254_s13] sm:$0xff] %vm269_vm6, %v3065_v51 }
 0x82a   :  { %3070 = vst.msk [vmem:[%s4254_s13 + $0x8] sm:$0xff] %vm269_vm6, %v3066_v61 }
 0x82b   :  { %3071 = vst.msk [vmem:[%s4254_s13 + $0x10] sm:$0xff] %vm269_vm6, %v3067_v55 }
 0x82c   :  { %3072 = vst.msk [vmem:[%s4254_s13 + $0x18] sm:$0xff] %vm269_vm6, %v3068_v63 }

</bundles_post_ra>
